<compile_context>
chip_gen: v5e
topology: v5e:2x2
jax: 0.10.0
libtpu: 0.0.40
codegen_flags: <defaults>
</compile_context>

<pallas_src>
import math

import jax
import jax.numpy as jnp
from jax.experimental import pallas as pl
from jax.experimental.pallas import tpu as pltpu


def _vfe_kernel(feat_ref, n_ref, m_ref, out_ref):
    # feat_ref: (TR, K*P*C)   lane-dense slab, K voxels per row
    # n_ref   : (TR, K*C)     f32 num_voxels broadcast across the C channels
    # m_ref   : (K*P*C, K*C)  constant block-diagonal 0/1 reduction matrix (resident)
    # out_ref : (TR, K*C)
    s = jnp.dot(
        feat_ref[...],
        m_ref[...],
        preferred_element_type=jnp.float32,
        precision=jax.lax.Precision.HIGHEST,   # exact f32 point-sum on the MXU
    )
    out_ref[...] = (s / n_ref[...]).astype(out_ref.dtype)


def _vmem_capacity_bytes():
    try:
        cap = getattr(pltpu.get_tpu_info(), "vmem_capacity_bytes", None)
        if cap:
            return int(cap)
    except Exception:
        pass
    return 64 * 1024 * 1024  # v7x-safe fallback


def voxel_feature_extractor_v3(features, num_voxels, num_input_features=4):
    """features: (V, P, C) float, num_voxels: (V,) int -> (V, C) float (points mean)."""
    V, P, C = features.shape
    assert num_input_features == C, "num_input_features mismatch"
    dtype = features.dtype
    itemsize = dtype.itemsize

    # K voxels per slab row: smallest K with K*C % 128 == 0 (=> K*P*C % 128 == 0 too).
    K = 128 // math.gcd(C, 128)
    L_in, L_out = K * P * C, K * C

    # Round V up to a multiple of K (<= K-1 dummy voxels).  When V is already a multiple
    # of K this path is a pure, copy-free reshape.
    pad_v = (-V) % K
    flat = features.reshape(V * P * C)
    nv = num_voxels.astype(jnp.float32)
    if pad_v:
        # TODO(synk): this concatenate costs one extra HBM pass over `features`; feed a
        # K-aligned voxel count (multiple of 32 for C=4) to stay fully copy-free.
        flat = jnp.concatenate([flat, jnp.zeros((pad_v * P * C,), dtype)])
        nv = jnp.concatenate([nv, jnp.ones((pad_v,), jnp.float32)])
    VK = V + pad_v
    Rv = VK // K

    feat_slab = flat.reshape(Rv, L_in)              # lane-dense input slab
    n_slab = jnp.repeat(nv, C).reshape(Rv, L_out)   # lane-dense divisor slab (tiny)

    # Constant block-diagonal reduction matrix: M[k*P*C + p*C + c, k*C + c] = 1.
    i = jnp.arange(L_in)
    j = jnp.arange(L_out)
    M = (
        (i[:, None] // (P * C) == j[None, :] // C)
        & (i[:, None] % C == j[None, :] % C)
    ).astype(dtype)

    # ---- generation-aware tile sizing ----
    vmem_cap = _vmem_capacity_bytes()
    budget = int(0.45 * vmem_cap)  # headroom for double buffers + in-kernel temporaries
    m_bytes = 2 * L_in * L_out * itemsize
    per_row = (
        2 * L_in * itemsize + 2 * L_in * 4   # input blocks (+ f32 matmul staging margin)
        + 2 * L_out * 4                      # divisor blocks
        + 2 * L_out * itemsize               # output blocks
        + 4 * L_out * 4                      # f32 temporaries / margin
    )
    tile_rows = max(8, (budget - m_bytes) // per_row)
    tile_rows = min(tile_rows, Rv)
    if Rv >= 16:
        # Keep >= 2 grid steps so ("parallel",) can shard slab tiles across v7x's two TCs.
        half = ((Rv + 1) // 2 + 7) // 8 * 8
        tile_rows = min(tile_rows, half)
    if tile_rows >= 8:
        tile_rows = (tile_rows // 8) * 8     # sublane-aligned
    # else: tile_rows == Rv < 8, allowed because it equals the full array dim.

    grid = (pl.cdiv(Rv, tile_rows),)

    cost = pl.CostEstimate(
        flops=2 * Rv * L_in * L_out,
        transcendentals=0,
        bytes_accessed=(Rv * L_in + Rv * L_out) * itemsize
        + Rv * L_out * 4
        + L_in * L_out * itemsize,
    )

    out_slab = pl.pallas_call(
        _vfe_kernel,
        out_shape=jax.ShapeDtypeStruct((Rv, L_out), dtype),
        grid=grid,
        in_specs=[
            pl.BlockSpec((tile_rows, L_in), lambda r: (r, 0)),
            pl.BlockSpec((tile_rows, L_out), lambda r: (r, 0)),
            pl.BlockSpec((L_in, L_out), lambda r: (0, 0)),    # VMEM-resident constant
        ],
        out_specs=pl.BlockSpec((tile_rows, L_out), lambda r: (r, 0)),
        compiler_params=pltpu.CompilerParams(
            dimension_semantics=("parallel",),
            vmem_limit_bytes=int(0.9 * vmem_cap),
        ),
        cost_estimate=cost,
    )(feat_slab, n_slab, M)

    out = out_slab.reshape(VK, C)
    return out[:V] if pad_v else out


def reference(features, num_voxels, num_input_features=4):
    pm = features[:, :, :num_input_features].sum(axis=1)
    return pm / num_voxels.astype(features.dtype).reshape(-1, 1)


def _make_inputs(key, V, P, C):
    kf, kn = jax.random.split(key)
    features = jax.random.normal(kf, (V, P, C), dtype=jnp.float32)
    num_voxels = jax.random.randint(kn, (V,), 1, P + 1, dtype=jnp.int32)
    # Zero out padded point slots (points beyond num_voxels), as the voxelizer would.
    point_ids = jnp.arange(P)[None, :, None]
    mask = (point_ids < num_voxels[:, None, None]).astype(features.dtype)
    return features * mask, num_voxels


if __name__ == "__main__":
    key = jax.random.PRNGKey(0)
    k1, k2, k3 = jax.random.split(key, 3)

    # 1) K-aligned V (copy-free slab view), single slab row, grid of 1.
    V, P, C = 32, 8, 4
    f, n = _make_inputs(k1, V, P, C)
    out = jax.block_until_ready(voxel_feature_extractor_v3(f, n, num_input_features=C))
    ref = reference(f, n, C)
    assert out.shape == (V, C)
    assert jnp.allclose(out, ref, atol=1e-5, rtol=1e-5), "mismatch vs reference (test 1)"

    # 2) Ragged V (pads 5 dummy voxels up to K=32) and odd P.
    V, P, C = 37, 5, 4
    f, n = _make_inputs(k2, V, P, C)
    out = jax.block_until_ready(voxel_feature_extractor_v3(f, n, num_input_features=C))
    ref = reference(f, n, C)
    assert out.shape == (V, C)
    assert jnp.allclose(out, ref, atol=1e-5, rtol=1e-5), "mismatch vs reference (test 2)"

    # 3) Multi-step grid with a partial (clipped) last block: Rv=45 slab rows, 2 steps.
    V, P, C = 45 * 32, 5, 4
    f, n = _make_inputs(k3, V, P, C)
    out = jax.block_until_ready(voxel_feature_extractor_v3(f, n, num_input_features=C))
    ref = reference(f, n, C)
    assert out.shape == (V, C)
    assert jnp.allclose(out, ref, atol=1e-5, rtol=1e-5), "mismatch vs reference (test 3)"

    print("KERNEL_OK")
</pallas_src>

<mosaic_0001>
module attributes {stable_mosaic.version = 11 : i64} {
  func.func @_vfe_kernel(%arg0: i32, %arg1: memref<1x1024xf32, #tpu.memory_space<vmem>>, %arg2: memref<1x128xf32, #tpu.memory_space<vmem>>, %arg3: memref<1024x128xf32, #tpu.memory_space<vmem>>, %arg4: memref<1x128xf32, #tpu.memory_space<vmem>>) attributes {dimension_semantics = [#tpu.dimension_semantics<parallel>], iteration_bounds = array<i64: 1>, scalar_prefetch = 0 : i64, scratch_operands = 0 : i64, tpu.core_type = #tpu.core_type<tc>, window_params = [{transform_indices = @transform_0, window_bounds = array<i64: 1, 1024>}, {transform_indices = @transform_1, window_bounds = array<i64: 1, 128>}, {pipeline_mode = #tpu.pipeline_mode<synchronous>, transform_indices = @transform_2, window_bounds = array<i64: 1024, 128>}, {transform_indices = @transform_3, window_bounds = array<i64: 1, 128>}]} {
    %c0 = arith.constant 0 : index
    %c0_0 = arith.constant 0 : index
    %0 = vector.load %arg1[%c0, %c0_0] : memref<1x1024xf32, #tpu.memory_space<vmem>>, vector<1x1024xf32>
    %c0_1 = arith.constant 0 : index
    %c0_2 = arith.constant 0 : index
    %1 = vector.load %arg3[%c0_1, %c0_2] : memref<1024x128xf32, #tpu.memory_space<vmem>>, vector<1024x128xf32>
    %cst = arith.constant dense<0.000000e+00> : vector<1x128xf32>
    %2 = tpu.matmul %0, %1, %cst {dimension_numbers = #tpu.dot_dimension_numbers<[1], [0], [0], [1], [0, 0, 1, 1], [], []>, precision = #tpu.contract_precision<fp32>} : vector<1x1024xf32>, vector<1024x128xf32>, vector<1x128xf32> -> vector<1x128xf32>
    %c0_3 = arith.constant 0 : index
    %c0_4 = arith.constant 0 : index
    %3 = vector.load %arg2[%c0_3, %c0_4] : memref<1x128xf32, #tpu.memory_space<vmem>>, vector<1x128xf32>
    %4 = arith.divf %2, %3 : vector<1x128xf32>
    %c0_5 = arith.constant 0 : index
    %c0_6 = arith.constant 0 : index
    %5 = vector.load %arg4[%c0_5, %c0_6] : memref<1x128xf32, #tpu.memory_space<vmem>>, vector<1x128xf32>
    tpu.vector_store %arg4[%c0_5, %c0_6], %4 {strides = array<i32>} : memref<1x128xf32, #tpu.memory_space<vmem>>, vector<1x128xf32>,
    return
  }
  func.func @transform_0(%arg0: i32) -> (i32, i32) {
    %c0_i32 = arith.constant 0 : i32
    %c0_i32_0 = arith.constant 0 : i32
    return %arg0, %c0_i32 : i32, i32
  }
  func.func @transform_1(%arg0: i32) -> (i32, i32) {
    %c0_i32 = arith.constant 0 : i32
    %c0_i32_0 = arith.constant 0 : i32
    return %arg0, %c0_i32 : i32, i32
  }
  func.func @transform_2(%arg0: i32) -> (i32, i32) {
    %c0_i32 = arith.constant 0 : i32
    %c0_i32_0 = arith.constant 0 : i32
    %c0_i32_1 = arith.constant 0 : i32
    return %c0_i32, %c0_i32_0 : i32, i32
  }
  func.func @transform_3(%arg0: i32) -> (i32, i32) {
    %c0_i32 = arith.constant 0 : i32
    %c0_i32_0 = arith.constant 0 : i32
    return %arg0, %c0_i32 : i32, i32
  }
}

</mosaic_0001>

<bundles_post_ra>
// kernel: tpu_custom_call.1
= control target key start
LH: loop header
LB: loop body
LE: loop exit
PB: predicated region body
PF: predicated region fallthrough
CT: control target
= control target key end

     0   :  { %8 = vsyncpa [#allocation3], 0  ;;  %s5164_s0 = inlined_call_operand.hbm [shape: f32[1,1024], index: 0, kind: input, shape index: {}]   ;;  %s5165_s1 = inlined_call_operand.hbm [shape: f32[1,128], index: 1, kind: input, shape index: {}]   ;;  %s5166_s2 = inlined_call_operand.hbm [shape: f32[1024,128], index: 2, kind: input, shape index: {}]   ;;  %s5167_s3 = inlined_call_operand.hbm [shape: f32[1,128], index: 3, kind: output, shape index: {}]  }
   0x1   :  { %9 = vsyncpa [#allocation6], 0  ;;  %s27_s14 = sshll.u32 %s5165_s1, 4  ;;  %s28_s14 = int_to_ptr.hbm [resolvable:$true] %s27_s14 }
   0x2   :  { %10 = vsyncpa [#allocation4], 0  ;;  %s3079_s15 = smov [#allocation5]   ;;  %s16_s19 = sshll.u32 %s5164_s0, 4  ;;  %s17_s19 = int_to_ptr.hbm [resolvable:$true] %s16_s19 }
   0x3   :  { %s29_s16 = sshll.u32 %s3079_s15, 4  ;;  %s3080_s20 = smov [#allocation2]   ;;  %s30_s16 = int_to_ptr.vmem [resolvable:$true] %s29_s16 }
   0x4   :  { %32 = dma.hbm_to_vmem [thread:$0]  %s28_s14, 16, %s30_s16, [#allocation6]  }
   0x5   :  { %s18_s21 = sshll.u32 %s3080_s20, 4  ;;  %s37_s24 = sshll.u32 %s5166_s2, 4  ;;  %s19_s21 = int_to_ptr.vmem [resolvable:$true] %s18_s21  ;;  %s38_s24 = int_to_ptr.hbm [resolvable:$true] %s37_s24 }
   0x6   :  { %21 = dma.hbm_to_vmem [thread:$0]  %s17_s19, 128, %s19_s21, [#allocation3]  }
   0x7   :  { %s3081_s1 = smov [#allocation7]   ;;  %s3082_s26 = smov 128  }
   0x8   :  { %s39_s25 = sshll.u32 %s3081_s1, 4  ;;  %s3083_s27 = smov 8   ;;  %s40_s25 = int_to_ptr.vmem [resolvable:$true] %s39_s25 }
   0x9   :  { %45 = dma.hbm_to_vmem [thread:$0]  %s38_s24, 16384, %s40_s25, [#allocation6], %s3082_s26, %s3082_s26, %s3083_s27  }
   0xa   :  { %3073 = dma.done.wait [#allocation3], 128  }
   0xb   :  { %3074 = vsyncadd [#allocation3], 4294967168 }
   0xc   :  { %3075 = dma.done.wait [#allocation6], 16400  }
   0xd   :  { %3076 = vsyncadd [#allocation6], 4294950896  ;;  %v74_v0 = vld [vmem:[#allocation7 + $0x78] sm:$0xff]  ;;  %v73_v1 = vld [vmem:[#allocation7 + $0x70] sm:$0xff]  ;;  %s3084_s0 = smov [#allocation8]   ;;  %s2956_s30 = sshll.u32 %s5167_s3, 4  ;;  %s2957_s30 = int_to_ptr.hbm [resolvable:$true] %s2956_s30 }
   0xe   :  { %v72_v2 = vld [vmem:[#allocation7 + $0x68] sm:$0xff]  ;;  %v3114_v3 = vand.u32 4294901760, %v74_v0  ;;  %v3116_v4 = vand.u32 4294901760, %v73_v1  ;;  %v71_v6 = vld [vmem:[#allocation7 + $0x60] sm:$0xff]  ;;  %v70_v7 = vld [vmem:[#allocation7 + $0x58] sm:$0xff]  ;;  %s2954_s2 = sshll.u32 %s3084_s0, 4  ;;  %s2955_s2 = int_to_ptr.vmem [resolvable:$true] %s2954_s2 }
   0xf   :  { %v3118_v5 = vand.u32 4294901760, %v72_v2  ;;  %v69_v8 = vld [vmem:[#allocation7 + $0x50] sm:$0xff]  ;;  %v3120_v9 = vand.u32 4294901760, %v71_v6  ;;  %v3122_v10 = vand.u32 4294901760, %v70_v7  ;;  %v68_v12 = vld [vmem:[#allocation7 + $0x48] sm:$0xff]  ;;  %v67_v13 = vld [vmem:[#allocation7 + $0x40] sm:$0xff] }
  0x10   :  { %v3124_v11 = vand.u32 4294901760, %v69_v8  ;;  %205 = vmatpush.msra.mxu0 %v3114_v3  ;;  %v3128_v14 = vsub.f32 %v74_v0, %v3114_v3  ;;  %v3131_v15 = vsub.f32 %v73_v1, %v3116_v4  ;;  %401 = vmatpush.msra.mxu3 %v3114_v3  ;;  %v3137_v17 = vand.u32 4294901760, %v68_v12  ;;  %v66_v18 = vld [vmem:[#allocation7 + $0x38] sm:$0xff]  ;;  %v65_v26 = vld [vmem:[#allocation7 + $0x30] sm:$0xff]  ;;  %v64_v34 = vld [vmem:[#allocation7 + $0x28] sm:$0xff] }
  0x11   :  { %v3135_v16 = vsub.f32 %v72_v2, %v3118_v5  ;;  %v3140_v19 = vsub.f32 %v71_v6, %v3120_v9  ;;  %v3143_v20 = vsub.f32 %v70_v7, %v3122_v10  ;;  %v3145_v21 = vand.u32 4294901760, %v67_v13  ;;  %v63_v42 = vld [vmem:[#allocation7 + $0x20] sm:$0xff]  ;;  %v62_v48 = vld [vmem:[#allocation7 + $0x18] sm:$0xff]  ;;  %v61_v54 = vld [vmem:[#allocation7 + $0x10] sm:$0xff] }
  0x12   :  { %207 = vmatpush.msra.mxu0 %v3116_v4  ;;  %348 = vmatpush.msra.mxu2 %v3128_v14  ;;  %v247_v22 = vand.u32 4294901760, %v3128_v14  ;;  %v5182_v23 = vand.u32 4294901760, %v3131_v15  ;;  %v3153_v25 = vsub.f32 %v69_v8, %v3124_v11  ;;  %v3157_v28 = vand.u32 4294901760, %v66_v18  ;;  %v90_v59 = vld [vmem:[#allocation7 + $0xf8] sm:$0xff]  ;;  %v60_v61 = vld [vmem:[#allocation7 + $0x8] sm:$0xff]  ;;  %v89_v2 = vld [vmem:[#allocation7 + $0xf0] sm:$0xff] }
  0x13   :  { %v5181_v24 = vand.u32 4294901760, %v3135_v16  ;;  %403 = vmatpush.msra.mxu3 %v3116_v4  ;;  %v5180_v27 = vand.u32 4294901760, %v3140_v19  ;;  %v3160_v29 = vsub.f32 %v68_v12, %v3137_v17  ;;  %v5177_v33 = vand.u32 4294901760, %v3143_v20  ;;  %v59_v7 = vld [vmem:[#allocation7] sm:$0xff] }
  0x14   :  { %209 = vmatpush.msra.mxu0 %v3118_v5  ;;  %351 = vmatpush.msra.mxu2 %v3131_v15  ;;  %v248_v30 = vsub.f32 %v3128_v14, %v247_v22  ;;  %v254_v31 = vsub.f32 %v3131_v15, %v5182_v23  ;;  %v3175_v35 = vand.u32 4294901760, %v65_v26  ;;  %v3178_v36 = vsub.f32 %v67_v13, %v3145_v21  ;;  %v81_v23 = vld [vmem:[#allocation7 + $0xb0] sm:$0xff] }
  0x15   :  { %v260_v32 = vsub.f32 %v3135_v16, %v5181_v24  ;;  %405 = vmatpush.msra.mxu3 %v3118_v5  ;;  %v266_v39 = vsub.f32 %v3140_v19, %v5180_v27  ;;  %v5176_v40 = vand.u32 4294901760, %v3153_v25  ;;  %v3187_v41 = vand.u32 4294901760, %v64_v34 }
  0x16   :  { %211 = vmatpush.msra.mxu0 %v3120_v9  ;;  %v249_v37 = vand.u32 4294901760, %v248_v30  ;;  %354 = vmatpush.msra.mxu2 %v3135_v16  ;;  %v255_v38 = vand.u32 4294901760, %v254_v31  ;;  %v272_v44 = vsub.f32 %v3143_v20, %v5177_v33  ;;  %v5174_v45 = vand.u32 4294901760, %v3160_v29 }
  0x17   :  { %407 = vmatpush.msra.mxu3 %v3120_v9  ;;  %v261_v43 = vand.u32 4294901760, %v260_v32  ;;  %v3195_v46 = vsub.f32 %v66_v18, %v3157_v28  ;;  %v5173_v47 = vand.u32 4294901760, %v3178_v36  ;;  %v267_v49 = vand.u32 4294901760, %v266_v39  ;;  %v88_v32 = vld [vmem:[#allocation7 + $0xe8] sm:$0xff] }
  0x18   :  { %213 = vmatpush.msra.mxu0 %v3122_v10  ;;  %250 = vmatpush.msra.mxu1 %v249_v37  ;;  %v278_v50 = vsub.f32 %v3153_v25, %v5176_v40  ;;  %v3204_v51 = vand.u32 4294901760, %v63_v42  ;;  %v3207_v52 = vsub.f32 %v65_v26, %v3175_v35  ;;  %v3212_v53 = vsub.f32 %v64_v34, %v3187_v41 }
  0x19   :  { %357 = vmatpush.msra.mxu2 %v3140_v19  ;;  %409 = vmatpush.msra.mxu3 %v3122_v10  ;;  %v273_v55 = vand.u32 4294901760, %v272_v44  ;;  %v284_v56 = vsub.f32 %v3160_v29, %v5174_v45  ;;  %v3218_v57 = vand.u32 4294901760, %v62_v48  ;;  %v5172_v58 = vand.u32 4294901760, %v3195_v46 }
  0x1a   :  { %215 = vmatpush.msra.mxu0 %v3124_v11  ;;  %256 = vmatpush.msra.mxu1 %v255_v38  ;;  %v290_v60 = vsub.f32 %v3178_v36, %v5173_v47  ;;  %v279_v62 = vand.u32 4294901760, %v278_v50  ;;  %v3227_v63 = vand.u32 4294901760, %v61_v54  ;;  %v5170_v0 = vand.u32 4294901760, %v3207_v52 }
  0x1b   :  { %360 = vmatpush.msra.mxu2 %v3143_v20  ;;  %411 = vmatpush.msra.mxu3 %v3124_v11  ;;  %v3231_v1 = vsub.f32 %v63_v42, %v3204_v51  ;;  %v5168_v6 = vand.u32 4294901760, %v3212_v53  ;;  %v3236_v8 = vand.u32 4294901760, %v90_v59  ;;  %v285_v12 = vand.u32 4294901760, %v284_v56  ;;  %v87_v42 = vld [vmem:[#allocation7 + $0xe0] sm:$0xff] }
  0x1c   :  { %217 = vmatpush.msra.mxu0 %v3137_v17  ;;  %262 = vmatpush.msra.mxu1 %v261_v43  ;;  %v296_v13 = vsub.f32 %v3195_v46, %v5172_v58  ;;  %v3242_v18 = vand.u32 4294901760, %v60_v61  ;;  %v3245_v26 = vsub.f32 %v62_v48, %v3218_v57  ;;  %v291_v30 = vand.u32 4294901760, %v290_v60 }
  0x1d   :  { %363 = vmatpush.msra.mxu2 %v3153_v25  ;;  %413 = vmatpush.msra.mxu3 %v3137_v17  ;;  %5249 = vst [vmem:[#allocation12_spill] sm:$0xff] %v3236_v8  ;;  %v3249_v31 = vand.u32 4294901760, %v89_v2  ;;  %v302_v34 = vsub.f32 %v3207_v52, %v5170_v0  ;;  %v3255_v37 = vand.u32 4294901760, %v59_v7  ;;  %v5169_v38 = vand.u32 4294901760, %v3231_v1 }
  0x1e   :  { %219 = vmatpush.msra.mxu0 %v3145_v21  ;;  %268 = vmatpush.msra.mxu1 %v267_v49  ;;  %v3259_v39 = vsub.f32 %v61_v54, %v3227_v63  ;;  %v308_v43 = vsub.f32 %v3212_v53, %v5168_v6  ;;  %v3267_v44 = vsub.f32 %v90_v59, %v3236_v8  ;;  %v297_v48 = vand.u32 4294901760, %v296_v13  ;;  %v86_v59 = vld [vmem:[#allocation7 + $0xd8] sm:$0xff]  ;;  %v85_v6 = vld [vmem:[#allocation7 + $0xd0] sm:$0xff] }
  0x1f   :  { %366 = vmatpush.msra.mxu2 %v3160_v29  ;;  %415 = vmatpush.msra.mxu3 %v3145_v21  ;;  %5250 = vst [vmem:[#allocation13_spill] sm:$0xff] %v3255_v37  ;;  %v5171_v49 = vand.u32 4294901760, %v3245_v26  ;;  %v3272_v50 = vsub.f32 %v60_v61, %v3242_v18  ;;  %v3274_v54 = vand.u32 4294901760, %v88_v32  ;;  %v3281_v56 = vand.u32 4294901760, %v87_v42 }
  0x20   :  { %221 = vmatpush.msra.mxu0 %v3157_v28  ;;  %274 = vmatpush.msra.mxu1 %v273_v55  ;;  %v3279_v55 = vsub.f32 %v89_v2, %v3249_v31  ;;  %v303_v60 = vand.u32 4294901760, %v302_v34  ;;  %v314_v61 = vsub.f32 %v3231_v1, %v5169_v38  ;;  %v309_v2 = vand.u32 4294901760, %v308_v43  ;;  %v84_v43 = vld [vmem:[#allocation7 + $0xc8] sm:$0xff] }
  0x21   :  { %369 = vmatpush.msra.mxu2 %v3178_v36  ;;  %417 = vmatpush.msra.mxu3 %v3157_v28  ;;  %v5178_v13 = vand.u32 4294901760, %v3267_v44  ;;  %v5179_v34 = vand.u32 4294901760, %v3272_v50  ;;  %v3302_v38 = vand.u32 4294901760, %v86_v59  ;;  %v3315_v47 = vand.u32 4294901760, %v85_v6 }
  0x22   :  { %223 = vmatpush.msra.mxu0 %v3175_v35  ;;  %280 = vmatpush.msra.mxu1 %v279_v62  ;;  %v5175_v62 = vand.u32 4294901760, %v3259_v39  ;;  %v5183_v0 = vand.u32 4294901760, %v3279_v55  ;;  %v3322_v45 = vand.u32 4294901760, %v84_v43  ;;  %v5251_v14 = vand.u32 4294901760, %v3131_v15 }
  0x23   :  { %372 = vmatpush.msra.mxu2 %v3195_v46  ;;  %419 = vmatpush.msra.mxu3 %v3175_v35  ;;  %v3330_v33 = vsub.f32 %v86_v59, %v3302_v38  ;;  %v3343_v27 = vsub.f32 %v85_v6, %v3315_v47  ;;  %v5253_v15 = vand.u32 4294901760, %v3135_v16  ;;  %v5255_v16 = vand.u32 4294901760, %v3140_v19 }
  0x24   :  { %225 = vmatpush.msra.mxu0 %v3187_v41  ;;  %286 = vmatpush.msra.mxu1 %v285_v12  ;;  %v3289_v12 = vsub.f32 %v59_v7, %v3255_v37  ;;  %v3300_v7 = vsub.f32 %v88_v32, %v3274_v54  ;;  %v326_v32 = vsub.f32 %v3259_v39, %v5175_v62 }
  0x25   :  { %375 = vmatpush.msra.mxu2 %v3207_v52  ;;  %421 = vmatpush.msra.mxu3 %v3187_v41  ;;  %v332_v62 = vsub.f32 %v3272_v50, %v5179_v34 }
  0x26   :  { %227 = vmatpush.msra.mxu0 %v3204_v51  ;;  %292 = vmatpush.msra.mxu1 %v291_v30  ;;  %v320_v30 = vsub.f32 %v3245_v26, %v5171_v49  ;;  %v315_v49 = vand.u32 4294901760, %v314_v61  ;;  %v5184_v58 = vand.u32 4294901760, %v3289_v12  ;;  %v5185_v40 = vand.u32 4294901760, %v3300_v7 }
  0x27   :  { %378 = vmatpush.msra.mxu2 %v3212_v53  ;;  %423 = vmatpush.msra.mxu3 %v3204_v51  ;;  %v327_v34 = vand.u32 4294901760, %v326_v32 }
  0x28   :  { %229 = vmatpush.msra.mxu0 %v3218_v57  ;;  %298 = vmatpush.msra.mxu1 %v297_v48  ;;  %v3308_v48 = vsub.f32 %v87_v42, %v3281_v56  ;;  %v589_v42 = vsub.f32 %v3267_v44, %v5178_v13  ;;  %v321_v61 = vand.u32 4294901760, %v320_v30  ;;  %v595_v13 = vsub.f32 %v3279_v55, %v5183_v0  ;;  %v82_v30 = vld [vmem:[#allocation7 + $0xb8] sm:$0xff] }
  0x29   :  { %381 = vmatpush.msra.mxu2 %v3231_v1  ;;  %425 = vmatpush.msra.mxu3 %v3218_v57  ;;  %v338_v59 = vsub.f32 %v3289_v12, %v5184_v58  ;;  %v601_v6 = vsub.f32 %v3300_v7, %v5185_v40  ;;  %v3358_v58 = vand.u32 4294901760, %v82_v30 }
  0x2a   :  { %231 = vmatpush.msra.mxu0 %v3227_v63  ;;  %304 = vmatpush.msra.mxu1 %v303_v60  ;;  %v83_v60 = vld [vmem:[#allocation7 + $0xc0] sm:$0xff]  ;;  %v590_v0 = vand.u32 4294901760, %v589_v42  ;;  %v3366_v42 = vand.u32 4294901760, %v81_v23 }
  0x2b   :  { %384 = vmatpush.msra.mxu2 %v3245_v26  ;;  %427 = vmatpush.msra.mxu3 %v3227_v63  ;;  %v3345_v24 = vand.u32 4294901760, %v83_v60  ;;  %v339_v40 = vand.u32 4294901760, %v338_v59  ;;  %v5254_v59 = vand.u32 4294901760, %v3330_v33 }
  0x2c   :  { %233 = vmatpush.msra.mxu0 %v3242_v18  ;;  %310 = vmatpush.msra.mxu1 %v309_v2  ;;  %v3351_v2 = vsub.f32 %v84_v43, %v3322_v45  ;;  %v5252_v43 = vand.u32 4294901760, %v3308_v48 }
  0x2d   :  { %387 = vmatpush.msra.mxu2 %v3259_v39  ;;  %429 = vmatpush.msra.mxu3 %v3242_v18  ;;  %v613_v32 = vsub.f32 %v3330_v33, %v5254_v59 }
  0x2e   :  { %235 = vmatpush.msra.mxu0 %v3255_v37  ;;  %316 = vmatpush.msra.mxu1 %v315_v49  ;;  %v333_v49 = vand.u32 4294901760, %v332_v62  ;;  %v607_v62 = vsub.f32 %v3308_v48, %v5252_v43  ;;  %v3376_v43 = vld [vmem:[#allocation2] sm:$0xff] }
  0x2f   :  { %390 = vmatpush.msra.mxu2 %v3272_v50  ;;  %431 = vmatpush.msra.mxu3 %v3255_v37  ;;  %v3371_v37 = vsub.f32 %v83_v60, %v3345_v24  ;;  %v3383_v60 = vsub.f32 %v82_v30, %v3358_v58  ;;  %v188_v19 = vperm.slane %v3376_v43, 0 }
  0x30   :  { %442 = vmatpush.msrb.mxu0 %v247_v22  ;;  %322 = vmatpush.msra.mxu1 %v321_v61  ;;  %v596_v22 = vand.u32 4294901760, %v595_v13  ;;  %v80_v61 = vld [vmem:[#allocation7 + $0xa8] sm:$0xff] }
  0x31   :  { %393 = vmatpush.msra.mxu2 %v3289_v12  ;;  %591 = vmatpush.msrb.mxu3 %v590_v0  ;;  %v608_v0 = vand.u32 4294901760, %v607_v62  ;;  %v614_v62 = vand.u32 4294901760, %v613_v32  ;;  %v5260_v32 = vand.u32 4294901760, %v3371_v37 }
  0x32   :  { %446 = vmatpush.msrb.mxu0 %v5251_v14  ;;  %328 = vmatpush.msra.mxu1 %v327_v34  ;;  %v79_v14 = vld [vmem:[#allocation7 + $0xa0] sm:$0xff]  ;;  %v602_v34 = vand.u32 4294901760, %v601_v6  ;;  %v5256_v6 = vand.u32 4294901760, %v3343_v27 }
  0x33   :  { %546 = vmatpush.msrb.mxu2 %v3236_v8  ;;  %v3385_v8 = vand.u32 4294901760, %v80_v61  ;;  %597 = vmatpush.msrb.mxu3 %v596_v22  ;;  %v3397_v13 = vand.u32 4294901760, %v79_v14  ;;  %v5257_v22 = vand.u32 4294901760, %v3143_v20  ;;  %v5259_v20 = vand.u32 4294901760, %v3153_v25 }
  0x34   :  { %450 = vmatpush.msrb.mxu0 %v5253_v15  ;;  %334 = vmatpush.msra.mxu1 %v333_v49  ;;  %v3390_v15 = vsub.f32 %v81_v23, %v3366_v42  ;;  %v78_v49 = vld [vmem:[#allocation7 + $0x98] sm:$0xff]  ;;  %v619_v59 = vsub.f32 %v3343_v27, %v5256_v6  ;;  %v5258_v23 = vand.u32 4294901760, %v3351_v2  ;;  %v5261_v25 = vand.u32 4294901760, %v3160_v29 }
  0x35   :  { %548 = vmatpush.msrb.mxu2 %v3249_v31  ;;  %603 = vmatpush.msrb.mxu3 %v602_v34  ;;  %v3409_v6 = vsub.f32 %v80_v61, %v3385_v8  ;;  %v3411_v30 = vand.u32 4294901760, %v78_v49  ;;  %v3422_v61 = vsub.f32 %v79_v14, %v3397_v13  ;;  %v5263_v29 = vand.u32 4294901760, %v3178_v36 }
  0x36   :  { %454 = vmatpush.msrb.mxu0 %v5255_v16  ;;  %340 = vmatpush.msra.mxu1 %v339_v40  ;;  %v625_v40 = vsub.f32 %v3351_v2, %v5258_v23  ;;  %v620_v34 = vand.u32 4294901760, %v619_v59  ;;  %v631_v23 = vsub.f32 %v3371_v37, %v5260_v32  ;;  %v3424_v16 = vand.u32 4294901760, %v188_v19  ;;  %v75_v32 = vld [vmem:[#allocation7 + $0x80] sm:$0xff] }
  0x37   :  { %550 = vmatpush.msrb.mxu2 %v3274_v54  ;;  %609 = vmatpush.msrb.mxu3 %v608_v0  ;;  %v5262_v0 = vand.u32 4294901760, %v3383_v60  ;;  %v5265_v36 = vand.u32 4294901760, %v3195_v46 }
  0x38   :  { %458 = vmatpush.msrb.mxu0 %v5257_v22  ;;  %509 = vmatpush.msrb.mxu1 %v3114_v3  ;;  %v77_v22 = vld [vmem:[#allocation7 + $0x90] sm:$0xff]  ;;  %v3437_v3 = vsub.f32 %v78_v49, %v3411_v30 }
  0x39   :  { %552 = vmatpush.msrb.mxu2 %v3281_v56  ;;  %615 = vmatpush.msrb.mxu3 %v614_v62  ;;  %v637_v59 = vsub.f32 %v3383_v60, %v5262_v0  ;;  %v3434_v14 = vand.u32 4294901760, %v77_v22  ;;  %v632_v62 = vand.u32 4294901760, %v631_v23  ;;  %v3448_v0 = vsub.f32 %v188_v19, %v3424_v16 }
  0x3a   :  { %462 = vmatpush.msrb.mxu0 %v5259_v20  ;;  %511 = vmatpush.msrb.mxu1 %v3116_v4  ;;  %v626_v4 = vand.u32 4294901760, %v625_v40  ;;  %v76_v20 = vld [vmem:[#allocation7 + $0x88] sm:$0xff] }
  0x3b   :  { %554 = vmatpush.msrb.mxu2 %v3302_v38  ;;  %621 = vmatpush.msrb.mxu3 %v620_v34  ;;  %v3450_v49 = vand.u32 4294901760, %v76_v20  ;;  %v5266_v34 = vand.u32 4294901760, %v3409_v6  ;;  %v3461_v19 = vsub.f32 %v77_v22, %v3434_v14 }
  0x3c   :  { %466 = vmatpush.msrb.mxu0 %v5261_v25  ;;  %513 = vmatpush.msrb.mxu1 %v3118_v5  ;;  %v5264_v5 = vand.u32 4294901760, %v3390_v15  ;;  %v654_v25 = vand.u32 4294901760, %v3422_v61 }
  0x3d   :  { %556 = vmatpush.msrb.mxu2 %v3315_v47  ;;  %627 = vmatpush.msrb.mxu3 %v626_v4  ;;  %v649_v23 = vsub.f32 %v3409_v6, %v5266_v34  ;;  %v3474_v22 = vsub.f32 %v76_v20, %v3450_v49  ;;  %v5269_v20 = vand.u32 4294901760, %v3231_v1 }
  0x3e   :  { %470 = vmatpush.msrb.mxu0 %v5263_v29  ;;  %515 = vmatpush.msrb.mxu1 %v3120_v9  ;;  %v643_v40 = vsub.f32 %v3390_v15, %v5264_v5  ;;  %v638_v9 = vand.u32 4294901760, %v637_v59  ;;  %v660_v29 = vand.u32 4294901760, %v3437_v3  ;;  %v5267_v5 = vand.u32 4294901760, %v3207_v52 }
  0x3f   :  { %558 = vmatpush.msrb.mxu2 %v3322_v45  ;;  %633 = vmatpush.msrb.mxu3 %v632_v62  ;;  %v655_v4 = vsub.f32 %v3422_v61, %v654_v25  ;;  %v238_v59 = vand.u32 4294901760, %v3448_v0  ;;  %v189_v52 = vperm.slane %v3376_v43, 1  ;;  %v666_v62 = vand.u32 4294901760, %v3461_v19 }
  0x40   :  { %474 = vmatpush.msrb.mxu0 %v5265_v36  ;;  %517 = vmatpush.msrb.mxu1 %v3122_v10  ;;  %v644_v46 = vand.u32 4294901760, %v643_v40  ;;  %v3466_v10 = vand.u32 4294901760, %v75_v32  ;;  %v5268_v36 = vand.u32 4294901760, %v3212_v53  ;;  %v661_v40 = vsub.f32 %v3437_v3, %v660_v29 }
  0x41   :  { %560 = vmatpush.msrb.mxu2 %v3345_v24  ;;  %639 = vmatpush.msrb.mxu3 %v638_v9  ;;  %v239_v9 = vsub.f32 %v3448_v0, %v238_v59  ;;  %v672_v34 = vand.u32 4294901760, %v3474_v22  ;;  %v667_v1 = vsub.f32 %v3461_v19, %v666_v62 }
  0x42   :  { %478 = vmatpush.msrb.mxu0 %v5267_v5  ;;  %519 = vmatpush.msrb.mxu1 %v3124_v11  ;;  %v650_v11 = vand.u32 4294901760, %v649_v23  ;;  %v3489_v53 = vsub.f32 %v75_v32, %v3466_v10  ;;  %v3494_v23 = vand.u32 4294901760, %v189_v52  ;;  %v5270_v5 = vand.u32 4294901760, %v3245_v26 }
  0x43   :  { %562 = vmatpush.msrb.mxu2 %v3358_v58  ;;  %645 = vmatpush.msrb.mxu3 %v644_v46  ;;  %v5271_v32 = vand.u32 4294901760, %v3259_v39  ;;  %v240_v26 = vand.u32 4294901760, %v239_v9  ;;  %v5273_v39 = vand.u32 4294901760, %v3289_v12 }
  0x44   :  { %482 = vmatpush.msrb.mxu0 %v5268_v36  ;;  %521 = vmatpush.msrb.mxu1 %v3137_v17  ;;  %v656_v17 = vand.u32 4294901760, %v655_v4  ;;  %v678_v46 = vand.u32 4294901760, %v3489_v53  ;;  %v3512_v4 = vsub.f32 %v189_v52, %v3494_v23  ;;  %v5272_v36 = vand.u32 4294901760, %v3272_v50 }
  0x45   :  { %564 = vmatpush.msrb.mxu2 %v3366_v42  ;;  %651 = vmatpush.msrb.mxu3 %v650_v11 }
  0x46   :  { %486 = vmatpush.msrb.mxu0 %v5269_v20  ;;  %523 = vmatpush.msrb.mxu1 %v3145_v21  ;;  %v662_v21 = vand.u32 4294901760, %v661_v40  ;;  %v679_v11 = vsub.f32 %v3489_v53, %v678_v46  ;;  %v579_v52 = vand.u32 4294901760, %v3512_v4  ;;  %v5277_v40 = vld [vmem:[#allocation13_spill] sm:$0xff]  ;;  %v98_v20 = vld [vmem:[#allocation7 + $0x138] sm:$0xff] }
  0x47   :  { %566 = vmatpush.msrb.mxu2 %v3385_v8  ;;  %657 = vmatpush.msrb.mxu3 %v656_v17 }
  0x48   :  { %490 = vmatpush.msrb.mxu0 %v5270_v5  ;;  %525 = vmatpush.msrb.mxu1 %v3157_v28  ;;  %v673_v28 = vsub.f32 %v3474_v22, %v672_v34  ;;  %v97_v5 = vld [vmem:[#allocation7 + $0x130] sm:$0xff] }
  0x49   :  { %568 = vmatpush.msrb.mxu2 %v3397_v13  ;;  %663 = vmatpush.msrb.mxu3 %v662_v21 }
  0x4a   :  { %494 = vmatpush.msrb.mxu0 %v5271_v32  ;;  %527 = vmatpush.msrb.mxu1 %v3175_v35  ;;  %v668_v35 = vand.u32 4294901760, %v667_v1  ;;  %v674_v50 = vand.u32 4294901760, %v673_v28  ;;  %v3674_v32 = vand.u32 4294901760, %v98_v20 }
  0x4b   :  { %570 = vmatpush.msrb.mxu2 %v3411_v30  ;;  %241 = vmatmul.f32.vlgmr.msra.gmra.mxu0 %v240_v26  ;;  %v96_v26 = vld [vmem:[#allocation7 + $0x128] sm:$0xff] }
  0x4c   :  { %498 = vmatpush.msrb.mxu0 %v5272_v36  ;;  %529 = vmatpush.msrb.mxu1 %v3187_v41  ;;  %v680_v41 = vand.u32 4294901760, %v679_v11  ;;  %v3687_v36 = vand.u32 4294901760, %v97_v5  ;;  %v190_v11 = vperm.slane %v3376_v43, 2 }
  0x4d   :  { %572 = vmatpush.msrb.mxu2 %v3434_v14  ;;  %669 = vmatpush.msrb.mxu3 %v668_v35 }
  0x4e   :  { %502 = vmatpush.msrb.mxu0 %v5273_v39  ;;  %531 = vmatpush.msrb.mxu1 %v3204_v51  ;;  %v580_v51 = vsub.f32 %v3512_v4, %v579_v52  ;;  %v95_v39 = vld [vmem:[#allocation7 + $0x120] sm:$0xff] }
  0x4f   :  { %574 = vmatpush.msrb.mxu2 %v3450_v49  ;;  %675 = vmatpush.msrb.mxu3 %v674_v50 }
  0x50   :  { %689 = vmatpush.msra.mxu0 %v3267_v44  ;;  %533 = vmatpush.msrb.mxu1 %v3218_v57  ;;  %v5274_v57 = vand.u32 4294901760, %v3267_v44  ;;  %v581_v12 = vand.u32 4294901760, %v580_v51  ;;  %v5278_v44 = vand.u32 4294901760, %v3300_v7 }
  0x51   :  { %396 = vmatmul.f32.vlgmr.msra.gmra.mxu2 %v3448_v0  ;;  %435 = vmatmul.f32.vlgmr.msra.gmra.mxu3 %v238_v59  ;;  %v5276_v0 = vld [vmem:[#allocation12_spill] sm:$0xff] }
  0x52   :  { %692 = vmatpush.msra.mxu0 %v3279_v55  ;;  %535 = vmatpush.msrb.mxu1 %v3227_v63  ;;  %v5275_v63 = vand.u32 4294901760, %v3279_v55  ;;  %v5280_v55 = vand.u32 4294901760, %v3330_v33 }
  0x53   :  { %576 = vmatpush.msrb.mxu2 %v3466_v10  ;;  %681 = vmatpush.msrb.mxu3 %v680_v41  ;;  %v3700_v41 = vand.u32 4294901760, %v96_v26 }
  0x54   :  { %695 = vmatpush.msra.mxu0 %v3300_v7  ;;  %537 = vmatpush.msrb.mxu1 %v3242_v18  ;;  %v5279_v18 = vand.u32 4294901760, %v3308_v48  ;;  %v5286_v7 = vand.u32 4294901760, %v3409_v6 }
  0x55   :  { %783 = vmatpush.msra.mxu2 %v5274_v57  ;;  %342 = vmatmul.f32.vlgmr.msra.gmra.mxu1 %v3424_v16  ;;  %v94_v57 = vld [vmem:[#allocation7 + $0x118] sm:$0xff] }
  0x56   :  { %698 = vmatpush.msra.mxu0 %v3308_v48  ;;  %850 = vmatpush.msra.mxu3 %v5276_v0 }
  0x57   :  { %787 = vmatpush.msra.mxu2 %v5275_v63  ;;  %539 = vmatpush.msrb.mxu1 %v5277_v40  ;;  %v3716_v40 = vsub.f32 %v97_v5, %v3687_v36  ;;  %v91_v5 = vld [vmem:[#allocation7 + $0x100] sm:$0xff] }
  0x58   :  { %701 = vmatpush.msra.mxu0 %v3330_v33  ;;  %852 = vmatpush.msra.mxu3 %v3249_v31  ;;  %v5282_v33 = vand.u32 4294901760, %v3351_v2 }
  0x59   :  { %742 = vmatpush.msra.mxu1 %v5276_v0  ;;  %791 = vmatpush.msra.mxu2 %v5278_v44 }
  0x5a   :  { %582 = vmatmul.f32.vlgmr.msrb.gmra.mxu2 %v581_v12  ;;  %704 = vmatpush.msra.mxu0 %v3343_v27  ;;  %v3712_v12 = vand.u32 4294901760, %v95_v39 }
  0x5b   :  { %744 = vmatpush.msra.mxu1 %v3249_v31  ;;  %795 = vmatpush.msra.mxu2 %v5279_v18  ;;  %v5281_v31 = vand.u32 4294901760, %v3343_v27  ;;  %v106_v27 = vld [vmem:[#allocation7 + $0x178] sm:$0xff]  ;;  %v93_v18 = vld [vmem:[#allocation7 + $0x110] sm:$0xff] }
  0x5c   :  { %854 = vmatpush.msra.mxu3 %v3274_v54  ;;  %504 = vmatmul.f32.vlgmr.msrb.gmra.mxu0 %v3424_v16 }
  0x5d   :  { %683 = vmatmul.f32.vlgmr.msrb.gmra.mxu3 %v3494_v23  ;;  %707 = vmatpush.msra.mxu0 %v3351_v2 }
  0x5e   :  { %746 = vmatpush.msra.mxu1 %v3274_v54  ;;  %799 = vmatpush.msra.mxu2 %v5280_v55  ;;  %v5283_v54 = vand.u32 4294901760, %v3371_v37  ;;  %v3720_v55 = vand.u32 4294901760, %v190_v11 }
  0x5f   :  { %856 = vmatpush.msra.mxu3 %v3281_v56  ;;  %541 = vmatmul.f32.vlgmr.msrb.gmra.mxu1 %v3424_v16  ;;  %v101_v16 = vld [vmem:[#allocation7 + $0x150] sm:$0xff] }
  0x60   :  { %710 = vmatpush.msra.mxu0 %v3371_v37  ;;  %748 = vmatpush.msra.mxu1 %v3281_v56  ;;  %v5285_v37 = vand.u32 4294901760, %v3390_v15  ;;  %v3588_v56 = vand.u32 4294901760, %v106_v27 }
  0x61   :  { %803 = vmatpush.msra.mxu2 %v5281_v31  ;;  %858 = vmatpush.msra.mxu3 %v3302_v38 }
  0x62   :  { %713 = vmatpush.msra.mxu0 %v3383_v60  ;;  %750 = vmatpush.msra.mxu1 %v3302_v38  ;;  %v5284_v38 = vand.u32 4294901760, %v3383_v60  ;;  %v102_v60 = vld [vmem:[#allocation7 + $0x158] sm:$0xff] }
  0x63   :  { %807 = vmatpush.msra.mxu2 %v5282_v33  ;;  %860 = vmatpush.msra.mxu3 %v3315_v47  ;;  %v3726_v33 = vand.u32 4294901760, %v94_v57 }
  0x64   :  { %716 = vmatpush.msra.mxu0 %v3390_v15  ;;  %752 = vmatpush.msra.mxu1 %v3315_v47  ;;  %v105_v47 = vld [vmem:[#allocation7 + $0x170] sm:$0xff] }
  0x65   :  { %811 = vmatpush.msra.mxu2 %v5283_v54  ;;  %862 = vmatpush.msra.mxu3 %v3322_v45  ;;  %v3595_v48 = vand.u32 4294901760, %v105_v47 }
  0x66   :  { %719 = vmatpush.msra.mxu0 %v3409_v6  ;;  %754 = vmatpush.msra.mxu1 %v3322_v45  ;;  %v104_v45 = vld [vmem:[#allocation7 + $0x168] sm:$0xff]  ;;  %v3619_v6 = vand.u32 4294901760, %v102_v60 }
  0x67   :  { %815 = vmatpush.msra.mxu2 %v5284_v38  ;;  %864 = vmatpush.msra.mxu3 %v3345_v24  ;;  %v3602_v2 = vand.u32 4294901760, %v104_v45  ;;  %v3615_v15 = vsub.f32 %v105_v47, %v3595_v48 }
  0x68   :  { %722 = vmatpush.msra.mxu0 %v3422_v61  ;;  %756 = vmatpush.msra.mxu1 %v3345_v24  ;;  %v103_v24 = vld [vmem:[#allocation7 + $0x160] sm:$0xff]  ;;  %v3630_v61 = vand.u32 4294901760, %v101_v16 }
  0x69   :  { %819 = vmatpush.msra.mxu2 %v5285_v37  ;;  %866 = vmatpush.msra.mxu3 %v3358_v58  ;;  %v3738_v37 = vand.u32 4294901760, %v93_v18 }
  0x6a   :  { %725 = vmatpush.msra.mxu0 %v3437_v3  ;;  %758 = vmatpush.msra.mxu1 %v3358_v58  ;;  %v3605_v58 = vsub.f32 %v106_v27, %v3588_v56  ;;  %v3626_v3 = vsub.f32 %v104_v45, %v3602_v2  ;;  %v3730_v27 = vsub.f32 %v96_v26, %v3700_v41  ;;  %v5191_v45 = vand.u32 4294901760, %v3716_v40 }
  0x6b   :  { %823 = vmatpush.msra.mxu2 %v5286_v7  ;;  %868 = vmatpush.msra.mxu3 %v3366_v42  ;;  %v3742_v7 = vsub.f32 %v95_v39, %v3712_v12  ;;  %v121_v39 = vld [vmem:[#allocation7 + $0x1f0] sm:$0xff] }
  0x6c   :  { %728 = vmatpush.msra.mxu0 %v3461_v19  ;;  %760 = vmatpush.msra.mxu1 %v3366_v42  ;;  %v3612_v42 = vand.u32 4294901760, %v103_v24  ;;  %v3642_v19 = vsub.f32 %v102_v60, %v3619_v6  ;;  %v3747_v60 = vsub.f32 %v190_v11, %v3720_v55 }
  0x6d   :  { %827 = vmatpush.msra.mxu2 %v654_v25  ;;  %870 = vmatpush.msra.mxu3 %v3385_v8  ;;  %v100_v25 = vld [vmem:[#allocation7 + $0x148] sm:$0xff]  ;;  %v5189_v26 = vand.u32 4294901760, %v3742_v7 }
  0x6e   :  { %731 = vmatpush.msra.mxu0 %v3474_v22  ;;  %762 = vmatpush.msra.mxu1 %v3385_v8  ;;  %v929_v8 = vand.u32 4294901760, %v3605_v58  ;;  %v3650_v22 = vand.u32 4294901760, %v100_v25 }
  0x6f   :  { %831 = vmatpush.msra.mxu2 %v660_v29  ;;  %872 = vmatpush.msra.mxu3 %v3397_v13  ;;  %v3637_v29 = vsub.f32 %v103_v24, %v3612_v42  ;;  %v92_v24 = vld [vmem:[#allocation7 + $0x108] sm:$0xff] }
  0x70   :  { %734 = vmatpush.msra.mxu0 %v3489_v53  ;;  %764 = vmatpush.msra.mxu1 %v3397_v13  ;;  %v935_v13 = vand.u32 4294901760, %v3615_v15  ;;  %v930_v59 = vsub.f32 %v3605_v58, %v929_v8 }
  0x71   :  { %835 = vmatpush.msra.mxu2 %v666_v62  ;;  %874 = vmatpush.msra.mxu3 %v3411_v30  ;;  %v941_v62 = vand.u32 4294901760, %v3626_v3  ;;  %v5199_v9 = vand.u32 4294901760, %v3637_v29 }
  0x72   :  { %737 = vmatmul.f32.vlgmr.msra.gmra.mxu0 %v3512_v4  ;;  %766 = vmatpush.msra.mxu1 %v3411_v30  ;;  %v99_v30 = vld [vmem:[#allocation7 + $0x140] sm:$0xff]  ;;  %v936_v53 = vsub.f32 %v3615_v15, %v935_v13  ;;  %v931_v21 = vand.u32 4294901760, %v930_v59  ;;  %v3704_v4 = vsub.f32 %v98_v20, %v3674_v32  ;;  %v3755_v59 = vsub.f32 %v94_v57, %v3726_v33  ;;  %v122_v20 = vld [vmem:[#allocation7 + $0x1f8] sm:$0xff] }
  0x73   :  { %887 = vmatpush.msrb.mxu0 %v3588_v56  ;;  %839 = vmatpush.msra.mxu2 %v672_v34  ;;  %v3663_v17 = vand.u32 4294901760, %v99_v30  ;;  %v5198_v34 = vand.u32 4294901760, %v3642_v19  ;;  %v942_v1 = vsub.f32 %v3626_v3, %v941_v62  ;;  %v948_v28 = vsub.f32 %v3637_v29, %v5199_v9 }
  0x74   :  { %876 = vmatpush.msra.mxu3 %v3434_v14  ;;  %768 = vmatpush.msra.mxu1 %v3434_v14  ;;  %v3656_v14 = vsub.f32 %v101_v16, %v3630_v61  ;;  %v5193_v54 = vand.u32 4294901760, %v3704_v4  ;;  %v5192_v57 = vand.u32 4294901760, %v3755_v59 }
  0x75   :  { %889 = vmatpush.msrb.mxu0 %v3595_v48  ;;  %843 = vmatpush.msra.mxu2 %v678_v46  ;;  %v3677_v46 = vsub.f32 %v100_v25, %v3650_v22  ;;  %v3690_v35 = vsub.f32 %v99_v30, %v3663_v17  ;;  %v943_v50 = vand.u32 4294901760, %v942_v1  ;;  %v949_v63 = vand.u32 4294901760, %v948_v28 }
  0x76   :  { %878 = vmatpush.msra.mxu3 %v3450_v49  ;;  %845 = vmatmul.f32.vlgmr.msra.gmra.mxu2 %v3494_v23  ;;  %v978_v25 = vsub.f32 %v3704_v4, %v5193_v54  ;;  %v5190_v30 = vand.u32 4294901760, %v3730_v27  ;;  %v984_v1 = vsub.f32 %v3716_v40, %v5191_v45  ;;  %v5202_v28 = vand.u32 4294901760, %v3747_v60  ;;  %v118_v45 = vld [vmem:[#allocation7 + $0x1d8] sm:$0xff] }
  0x77   :  { %891 = vmatpush.msrb.mxu0 %v3602_v2  ;;  %1030 = vmatpush.msrb.mxu2 %v3605_v58  ;;  %v5195_v51 = vand.u32 4294901760, %v3677_v46  ;;  %v5194_v0 = vand.u32 4294901760, %v3690_v35 }
  0x78   :  { %770 = vmatpush.msra.mxu1 %v3450_v49  ;;  %880 = vmatpush.msra.mxu3 %v3466_v10  ;;  %v5196_v49 = vand.u32 4294901760, %v3656_v14  ;;  %v979_v11 = vand.u32 4294901760, %v978_v25 }
  0x79   :  { %882 = vmatmul.f32.vlgmr.msra.gmra.mxu3 %v3494_v23  ;;  %893 = vmatpush.msrb.mxu0 %v3612_v42  ;;  %v937_v23 = vand.u32 4294901760, %v936_v53  ;;  %v966_v31 = vsub.f32 %v3677_v46, %v5195_v51  ;;  %v972_v47 = vsub.f32 %v3690_v35, %v5194_v0  ;;  %v3759_v53 = vand.u32 4294901760, %v92_v24 }
  0x7a   :  { %1033 = vmatpush.msrb.mxu2 %v3615_v15  ;;  %1083 = vmatpush.msrb.mxu3 %v3588_v56  ;;  %v3825_v51 = vand.u32 4294901760, %v118_v45 }
  0x7b   :  { %772 = vmatpush.msra.mxu1 %v3466_v10  ;;  %895 = vmatpush.msrb.mxu0 %v3619_v6  ;;  %v954_v10 = vsub.f32 %v3642_v19, %v5198_v34  ;;  %v967_v16 = vand.u32 4294901760, %v966_v31  ;;  %v996_v31 = vsub.f32 %v3742_v7, %v5189_v26 }
  0x7c   :  { %776 = vmatmul.f32.vlgmr.msra.gmra.mxu1 %v579_v52  ;;  %1036 = vmatpush.msrb.mxu2 %v3626_v3  ;;  %v960_v52 = vsub.f32 %v3656_v14, %v5196_v49 }
  0x7d   :  { %932 = vmatpush.msrb.mxu1 %v931_v21  ;;  %1085 = vmatpush.msrb.mxu3 %v3595_v48  ;;  %v955_v44 = vand.u32 4294901760, %v954_v10  ;;  %v973_v21 = vand.u32 4294901760, %v972_v47  ;;  %v3772_v10 = vand.u32 4294901760, %v122_v20  ;;  %v3791_v47 = vand.u32 4294901760, %v121_v39 }
  0x7e   :  { %897 = vmatpush.msrb.mxu0 %v3630_v61  ;;  %1039 = vmatpush.msrb.mxu2 %v3637_v29  ;;  %v961_v38 = vand.u32 4294901760, %v960_v52  ;;  %v3778_v52 = vand.u32 4294901760, %v91_v5 }
  0x7f   :  { %938 = vmatpush.msrb.mxu1 %v937_v23  ;;  %1087 = vmatpush.msrb.mxu3 %v3602_v2  ;;  %v3767_v23 = vsub.f32 %v93_v18, %v3738_v37  ;;  %v985_v18 = vand.u32 4294901760, %v984_v1  ;;  %v3799_v25 = vsub.f32 %v122_v20, %v3772_v10  ;;  %v1002_v1 = vsub.f32 %v3755_v59, %v5192_v57 }
  0x80   :  { %899 = vmatpush.msrb.mxu0 %v3650_v22  ;;  %1042 = vmatpush.msrb.mxu2 %v3642_v19  ;;  %5287 = vst [vmem:[#allocation12_spill] sm:$0xff] %v3778_v52  ;;  %v3806_v26 = vsub.f32 %v91_v5, %v3778_v52  ;;  %v3820_v57 = vsub.f32 %v121_v39, %v3791_v47 }
  0x81   :  { %944 = vmatpush.msrb.mxu1 %v943_v50  ;;  %1089 = vmatpush.msrb.mxu3 %v3612_v42  ;;  %v990_v50 = vsub.f32 %v3730_v27, %v5190_v30  ;;  %v5201_v0 = vand.u32 4294901760, %v3799_v25 }
  0x82   :  { %901 = vmatpush.msrb.mxu0 %v3663_v17  ;;  %1045 = vmatpush.msrb.mxu2 %v3656_v14  ;;  %v5203_v49 = vand.u32 4294901760, %v3806_v26  ;;  %v5204_v34 = vand.u32 4294901760, %v3820_v57 }
  0x83   :  { %950 = vmatpush.msrb.mxu1 %v949_v63  ;;  %1091 = vmatpush.msrb.mxu3 %v3619_v6  ;;  %v3784_v63 = vsub.f32 %v92_v24, %v3759_v53  ;;  %v921_v24 = vsub.f32 %v3747_v60, %v5202_v28  ;;  %v1271_v9 = vsub.f32 %v3799_v25, %v5201_v0  ;;  %v114_v28 = vld [vmem:[#allocation7 + $0x1b8] sm:$0xff] }
  0x84   :  { %903 = vmatpush.msrb.mxu0 %v3674_v32  ;;  %1048 = vmatpush.msrb.mxu2 %v3677_v46  ;;  %v1277_v58 = vsub.f32 %v3820_v57, %v5204_v34  ;;  %v5289_v34 = vand.u32 4294901760, %v3747_v60 }
  0x85   :  { %956 = vmatpush.msrb.mxu1 %v955_v44  ;;  %1093 = vmatpush.msrb.mxu3 %v3630_v61  ;;  %v120_v44 = vld [vmem:[#allocation7 + $0x1e8] sm:$0xff]  ;;  %v5200_v20 = vand.u32 4294901760, %v3784_v63  ;;  %v922_v54 = vand.u32 4294901760, %v921_v24 }
  0x86   :  { %905 = vmatpush.msrb.mxu0 %v3687_v36  ;;  %1051 = vmatpush.msrb.mxu2 %v3690_v35  ;;  %v3808_v30 = vand.u32 4294901760, %v120_v44 }
  0x87   :  { %962 = vmatpush.msrb.mxu1 %v961_v38  ;;  %1095 = vmatpush.msrb.mxu3 %v3650_v22  ;;  %v5197_v38 = vand.u32 4294901760, %v3767_v23  ;;  %v1014_v39 = vsub.f32 %v3784_v63, %v5200_v20  ;;  %v3849_v20 = vsub.f32 %v118_v45, %v3825_v51  ;;  %v113_v45 = vld [vmem:[#allocation7 + $0x1b0] sm:$0xff] }
  0x88   :  { %907 = vmatpush.msrb.mxu0 %v3700_v41  ;;  %1054 = vmatpush.msrb.mxu2 %v3704_v4 }
  0x89   :  { %968 = vmatpush.msrb.mxu1 %v967_v16  ;;  %1097 = vmatpush.msrb.mxu3 %v3663_v17  ;;  %v119_v16 = vld [vmem:[#allocation7 + $0x1e0] sm:$0xff]  ;;  %v1008_v5 = vsub.f32 %v3767_v23, %v5197_v38  ;;  %v3830_v38 = vsub.f32 %v120_v44, %v3808_v30  ;;  %v1015_v0 = vand.u32 4294901760, %v1014_v39  ;;  %v1272_v39 = vand.u32 4294901760, %v1271_v9 }
  0x8a   :  { %909 = vmatpush.msrb.mxu0 %v3712_v12  ;;  %1057 = vmatpush.msrb.mxu2 %v3716_v40 }
  0x8b   :  { %974 = vmatpush.msrb.mxu1 %v973_v21  ;;  %1099 = vmatpush.msrb.mxu3 %v3674_v32  ;;  %v991_v21 = vand.u32 4294901760, %v990_v50  ;;  %v997_v50 = vand.u32 4294901760, %v996_v31  ;;  %v1003_v31 = vand.u32 4294901760, %v1002_v1  ;;  %v1009_v1 = vand.u32 4294901760, %v1008_v5 }
  0x8c   :  { %911 = vmatpush.msrb.mxu0 %v3726_v33  ;;  %1060 = vmatpush.msrb.mxu2 %v3730_v27 }
  0x8d   :  { %980 = vmatpush.msrb.mxu1 %v979_v11  ;;  %1101 = vmatpush.msrb.mxu3 %v3687_v36  ;;  %v3813_v11 = vand.u32 4294901760, %v119_v16 }
  0x8e   :  { %913 = vmatpush.msrb.mxu0 %v3738_v37  ;;  %1063 = vmatpush.msrb.mxu2 %v3742_v7 }
  0x8f   :  { %986 = vmatpush.msrb.mxu1 %v985_v18  ;;  %1103 = vmatpush.msrb.mxu3 %v3700_v41  ;;  %v117_v18 = vld [vmem:[#allocation7 + $0x1d0] sm:$0xff]  ;;  %v3838_v24 = vsub.f32 %v119_v16, %v3813_v11  ;;  %v115_v16 = vld [vmem:[#allocation7 + $0x1c0] sm:$0xff] }
  0x90   :  { %915 = vmatpush.msrb.mxu0 %v3759_v53  ;;  %1066 = vmatpush.msrb.mxu2 %v3755_v59  ;;  %v3842_v44 = vand.u32 4294901760, %v117_v18 }
  0x91   :  { %992 = vmatpush.msrb.mxu1 %v991_v21  ;;  %1105 = vmatpush.msrb.mxu3 %v3712_v12  ;;  %v116_v21 = vld [vmem:[#allocation7 + $0x1c8] sm:$0xff]  ;;  %v5288_v9 = vand.u32 4294901760, %v3838_v24 }
  0x92   :  { %917 = vmatpush.msrb.mxu0 %v3778_v52  ;;  %1069 = vmatpush.msrb.mxu2 %v3767_v23  ;;  %v3857_v5 = vand.u32 4294901760, %v116_v21 }
  0x93   :  { %998 = vmatpush.msrb.mxu1 %v997_v50  ;;  %1107 = vmatpush.msrb.mxu3 %v3726_v33  ;;  %v1020_v50 = vsub.f32 %v3806_v26, %v5203_v49  ;;  %v1289_v3 = vsub.f32 %v3838_v24, %v5288_v9  ;;  %v5291_v9 = vand.u32 4294901760, %v3849_v20 }
  0x94   :  { %923 = vmatmul.f32.vlgmr.msrb.gmra.mxu0 %v922_v54  ;;  %1072 = vmatpush.msrb.mxu2 %v3784_v63  ;;  %v5205_v54 = vand.u32 4294901760, %v3830_v38 }
  0x95   :  { %1124 = vmatpush.msra.mxu0 %v929_v8  ;;  %1004 = vmatpush.msrb.mxu1 %v1003_v31  ;;  %v3868_v8 = vsub.f32 %v117_v18, %v3842_v44  ;;  %v3870_v31 = vand.u32 4294901760, %v115_v16  ;;  %v1021_v15 = vand.u32 4294901760, %v1020_v50  ;;  %v3882_v18 = vsub.f32 %v116_v21, %v3857_v5  ;;  %v110_v21 = vld [vmem:[#allocation7 + $0x198] sm:$0xff] }
  0x96   :  { %1109 = vmatpush.msrb.mxu3 %v3738_v37  ;;  %1075 = vmatpush.msrb.mxu2 %v3806_v26  ;;  %v5290_v50 = vand.u32 4294901760, %v3637_v29  ;;  %v5292_v29 = vand.u32 4294901760, %v3642_v19 }
  0x97   :  { %1128 = vmatpush.msra.mxu0 %v935_v13  ;;  %1010 = vmatpush.msrb.mxu1 %v1009_v1  ;;  %v1283_v13 = vsub.f32 %v3830_v38, %v5205_v54  ;;  %v3884_v1 = vand.u32 4294901760, %v114_v28  ;;  %v1278_v54 = vand.u32 4294901760, %v1277_v58  ;;  %v3896_v49 = vsub.f32 %v115_v16, %v3870_v31 }
  0x98   :  { %1111 = vmatpush.msrb.mxu3 %v3759_v53  ;;  %1078 = vmatmul.f32.vlgmr.msrb.gmra.mxu2 %v3747_v60  ;;  %v111_v60 = vld [vmem:[#allocation7 + $0x1a0] sm:$0xff]  ;;  %v5207_v58 = vand.u32 4294901760, %v3882_v18  ;;  %v5293_v19 = vand.u32 4294901760, %v3868_v8 }
  0x99   :  { %1132 = vmatpush.msra.mxu0 %v941_v62  ;;  %1228 = vmatpush.msra.mxu2 %v3772_v10  ;;  %v112_v62 = vld [vmem:[#allocation7 + $0x1a8] sm:$0xff]  ;;  %v3908_v16 = vsub.f32 %v114_v28, %v3884_v1 }
  0x9a   :  { %1016 = vmatpush.msrb.mxu1 %v1015_v0  ;;  %1113 = vmatpush.msrb.mxu3 %v3778_v52  ;;  %v3898_v0 = vand.u32 4294901760, %v113_v45  ;;  %v1295_v52 = vsub.f32 %v3849_v20, %v5291_v9  ;;  %v3922_v9 = vand.u32 4294901760, %v111_v60 }
  0x9b   :  { %1117 = vmatmul.f32.vlgmr.msrb.gmra.mxu3 %v5289_v34  ;;  %1136 = vmatpush.msra.mxu0 %v5290_v50  ;;  %v1284_v34 = vand.u32 4294901760, %v1283_v13  ;;  %v3910_v50 = vand.u32 4294901760, %v112_v62  ;;  %v109_v13 = vld [vmem:[#allocation7 + $0x190] sm:$0xff] }
  0x9c   :  { %1230 = vmatpush.msra.mxu2 %v3791_v47  ;;  %1273 = vmatpush.msra.mxu3 %v1272_v39  ;;  %v1290_v39 = vand.u32 4294901760, %v1289_v3  ;;  %v3920_v28 = vsub.f32 %v113_v45, %v3898_v0  ;;  %v1296_v3 = vand.u32 4294901760, %v1295_v52 }
  0x9d   :  { %1022 = vmatpush.msrb.mxu1 %v1021_v15  ;;  %1140 = vmatpush.msra.mxu0 %v5292_v29  ;;  %v1301_v15 = vsub.f32 %v3868_v8, %v5293_v19  ;;  %v5294_v29 = vand.u32 4294901760, %v3656_v14  ;;  %v3933_v45 = vsub.f32 %v112_v62, %v3910_v50  ;;  %v3935_v19 = vand.u32 4294901760, %v110_v21 }
  0x9e   :  { %1024 = vmatmul.f32.vlgmr.msrb.gmra.mxu1 %v3720_v55  ;;  %1232 = vmatpush.msra.mxu2 %v3808_v30  ;;  %v5295_v14 = vand.u32 4294901760, %v3677_v46  ;;  %v1324_v62 = vand.u32 4294901760, %v3920_v28  ;;  %v5297_v46 = vand.u32 4294901760, %v3690_v35  ;;  %v5299_v35 = vand.u32 4294901760, %v3704_v4 }
  0x9f   :  { %1191 = vmatpush.msra.mxu1 %v3588_v56  ;;  %1279 = vmatpush.msra.mxu3 %v1278_v54  ;;  %v1307_v56 = vsub.f32 %v3882_v18, %v5207_v58  ;;  %v1302_v52 = vand.u32 4294901760, %v1301_v15  ;;  %v3947_v58 = vsub.f32 %v111_v60, %v3922_v9  ;;  %v108_v54 = vld [vmem:[#allocation7 + $0x188] sm:$0xff]  ;;  %v3960_v60 = vsub.f32 %v110_v21, %v3935_v19 }
  0xa0   :  { %1144 = vmatpush.msra.mxu0 %v5294_v29  ;;  %1234 = vmatpush.msra.mxu2 %v3813_v11 }
  0xa1   :  { %1193 = vmatpush.msra.mxu1 %v3595_v48  ;;  %1285 = vmatpush.msra.mxu3 %v1284_v34  ;;  %v191_v48 = vperm.slane %v3376_v43, 3  ;;  %v5296_v34 = vand.u32 4294901760, %v3896_v49  ;;  %v3952_v43 = vand.u32 4294901760, %v109_v13  ;;  %v1336_v21 = vand.u32 4294901760, %v3947_v58 }
  0xa2   :  { %1148 = vmatpush.msra.mxu0 %v5295_v14  ;;  %1236 = vmatpush.msra.mxu2 %v3825_v51  ;;  %v1330_v14 = vand.u32 4294901760, %v3933_v45 }
  0xa3   :  { %1195 = vmatpush.msra.mxu1 %v3602_v2  ;;  %1291 = vmatpush.msra.mxu3 %v1290_v39  ;;  %v1313_v29 = vsub.f32 %v3896_v49, %v5296_v34  ;;  %v1308_v2 = vand.u32 4294901760, %v1307_v56  ;;  %v5298_v39 = vand.u32 4294901760, %v3908_v16  ;;  %v107_v34 = vld [vmem:[#allocation7 + $0x180] sm:$0xff]  ;;  %v1325_v56 = vsub.f32 %v3920_v28, %v1324_v62 }
  0xa4   :  { %1152 = vmatpush.msra.mxu0 %v5297_v46  ;;  %1238 = vmatpush.msra.mxu2 %v3842_v44  ;;  %v3965_v46 = vand.u32 4294901760, %v108_v54  ;;  %v3978_v4 = vsub.f32 %v109_v13, %v3952_v43 }
  0xa5   :  { %1197 = vmatpush.msra.mxu1 %v3612_v42  ;;  %1297 = vmatpush.msra.mxu3 %v1296_v3  ;;  %v1319_v15 = vsub.f32 %v3908_v16, %v5298_v39  ;;  %v3967_v42 = vand.u32 4294901760, %v191_v48  ;;  %v1314_v3 = vand.u32 4294901760, %v1313_v29  ;;  %v5300_v39 = vand.u32 4294901760, %v3716_v40 }
  0xa6   :  { %1156 = vmatpush.msra.mxu0 %v5299_v35  ;;  %1240 = vmatpush.msra.mxu2 %v3857_v5  ;;  %v3980_v35 = vand.u32 4294901760, %v107_v34  ;;  %v1342_v29 = vand.u32 4294901760, %v3960_v60  ;;  %v5301_v40 = vand.u32 4294901760, %v3730_v27  ;;  %v3991_v13 = vsub.f32 %v108_v54, %v3965_v46 }
  0xa7   :  { %1199 = vmatpush.msra.mxu1 %v3619_v6  ;;  %1303 = vmatpush.msra.mxu3 %v1302_v52  ;;  %v1320_v6 = vand.u32 4294901760, %v1319_v15  ;;  %v1331_v52 = vsub.f32 %v3933_v45, %v1330_v14  ;;  %v5302_v15 = vand.u32 4294901760, %v3742_v7  ;;  %v1348_v27 = vand.u32 4294901760, %v3978_v4 }
  0xa8   :  { %1160 = vmatpush.msra.mxu0 %v5300_v39  ;;  %1242 = vmatpush.msra.mxu2 %v3870_v31  ;;  %v3994_v39 = vsub.f32 %v191_v48, %v3967_v42  ;;  %v4005_v54 = vsub.f32 %v107_v34, %v3980_v35  ;;  %v1343_v48 = vsub.f32 %v3960_v60, %v1342_v29  ;;  %v1354_v7 = vand.u32 4294901760, %v3991_v13 }
  0xa9   :  { %1201 = vmatpush.msra.mxu1 %v3630_v61  ;;  %1309 = vmatpush.msra.mxu3 %v1308_v2  ;;  %v1326_v61 = vand.u32 4294901760, %v1325_v56  ;;  %v1337_v2 = vsub.f32 %v3947_v58, %v1336_v21 }
  0xaa   :  { %1164 = vmatpush.msra.mxu0 %v5301_v40  ;;  %1244 = vmatpush.msra.mxu2 %v3884_v1  ;;  %v1261_v56 = vand.u32 4294901760, %v3994_v39  ;;  %v5305_v40 = vand.u32 4294901760, %v3784_v63 }
  0xab   :  { %1203 = vmatpush.msra.mxu1 %v3650_v22  ;;  %1315 = vmatpush.msra.mxu3 %v1314_v3  ;;  %v1332_v22 = vand.u32 4294901760, %v1331_v52  ;;  %v5303_v3 = vand.u32 4294901760, %v3755_v59  ;;  %v1338_v34 = vand.u32 4294901760, %v1337_v2  ;;  %v1349_v59 = vsub.f32 %v3978_v4, %v1348_v27 }
  0xac   :  { %1168 = vmatpush.msra.mxu0 %v5302_v15  ;;  %1246 = vmatpush.msra.mxu2 %v3898_v0  ;;  %v1344_v52 = vand.u32 4294901760, %v1343_v48 }
  0xad   :  { %1205 = vmatpush.msra.mxu1 %v3663_v17  ;;  %1321 = vmatpush.msra.mxu3 %v1320_v6  ;;  %v5304_v17 = vand.u32 4294901760, %v3767_v23  ;;  %v1360_v6 = vand.u32 4294901760, %v4005_v54  ;;  %v1262_v23 = vsub.f32 %v3994_v39, %v1261_v56  ;;  %v1350_v63 = vand.u32 4294901760, %v1349_v59 }
  0xae   :  { %1172 = vmatpush.msra.mxu0 %v5303_v3  ;;  %1248 = vmatpush.msra.mxu2 %v3910_v50 }
  0xaf   :  { %1207 = vmatpush.msra.mxu1 %v3674_v32  ;;  %1327 = vmatpush.msra.mxu3 %v1326_v61  ;;  %v1355_v32 = vsub.f32 %v3991_v13, %v1354_v7  ;;  %v1361_v61 = vsub.f32 %v4005_v54, %v1360_v6 }
  0xb0   :  { %1176 = vmatpush.msra.mxu0 %v5304_v17  ;;  %1250 = vmatpush.msra.mxu2 %v3922_v9 }
  0xb1   :  { %1209 = vmatpush.msra.mxu1 %v3687_v36  ;;  %1333 = vmatpush.msra.mxu3 %v1332_v22  ;;  %v5306_v36 = vand.u32 4294901760, %v3806_v26  ;;  %v1356_v2 = vand.u32 4294901760, %v1355_v32  ;;  %v1362_v26 = vand.u32 4294901760, %v1361_v61  ;;  %v126_v61 = vld [vmem:[#allocation7 + $0x218] sm:$0xff] }
  0xb2   :  { %1180 = vmatpush.msra.mxu0 %v5305_v40  ;;  %1252 = vmatpush.msra.mxu2 %v3935_v19  ;;  %v4210_v40 = vld [vmem:[#allocation2] sm:$0xff] }
  0xb3   :  { %1211 = vmatpush.msra.mxu1 %v3700_v41  ;;  %1339 = vmatpush.msra.mxu3 %v1338_v34  ;;  %v1263_v41 = vand.u32 4294901760, %v1262_v23  ;;  %v128_v34 = vld [vmem:[#allocation7 + $0x228] sm:$0xff]  ;;  %v192_v32 = vperm.slane %v4210_v40, 4 }
  0xb4   :  { %1184 = vmatpush.msra.mxu0 %v5306_v36  ;;  %1254 = vmatpush.msra.mxu2 %v3952_v43  ;;  %v4214_v36 = vand.u32 4294901760, %v128_v34 }
  0xb5   :  { %1213 = vmatpush.msra.mxu1 %v3712_v12  ;;  %1345 = vmatpush.msra.mxu3 %v1344_v52  ;;  %v5307_v12 = vand.u32 4294901760, %v3799_v25  ;;  %v127_v52 = vld [vmem:[#allocation7 + $0x220] sm:$0xff] }
  0xb6   :  { %1186 = vmatmul.f32.vlgmr.msra.gmra.mxu0 %v3720_v55  ;;  %1256 = vmatpush.msra.mxu2 %v3965_v46 }
  0xb7   :  { %1371 = vmatpush.msrb.mxu0 %v3799_v25  ;;  %1215 = vmatpush.msra.mxu1 %v3726_v33  ;;  %v5308_v33 = vand.u32 4294901760, %v3820_v57  ;;  %v5310_v25 = vand.u32 4294901760, %v3830_v38 }
  0xb8   :  { %1351 = vmatpush.msra.mxu3 %v1350_v63  ;;  %1258 = vmatpush.msra.mxu2 %v3980_v35 }
  0xb9   :  { %1374 = vmatpush.msrb.mxu0 %v3820_v57  ;;  %1217 = vmatpush.msra.mxu1 %v3738_v37  ;;  %v5309_v37 = vld [vmem:[#allocation12_spill] sm:$0xff]  ;;  %v5314_v57 = vand.u32 4294901760, %v3882_v18 }
  0xba   :  { %1357 = vmatpush.msra.mxu3 %v1356_v2  ;;  %1264 = vmatmul.f32.vlgmr.msra.gmra.mxu2 %v1263_v41  ;;  %v4226_v41 = vand.u32 4294901760, %v127_v52 }
  0xbb   :  { %1377 = vmatpush.msrb.mxu0 %v3830_v38  ;;  %1465 = vmatpush.msrb.mxu2 %v5307_v12  ;;  %v5316_v38 = vand.u32 4294901760, %v3908_v16 }
  0xbc   :  { %1219 = vmatpush.msra.mxu1 %v3759_v53  ;;  %1363 = vmatpush.msra.mxu3 %v1362_v26  ;;  %v5311_v53 = vand.u32 4294901760, %v3838_v24 }
  0xbd   :  { %1365 = vmatmul.f32.vlgmr.msra.gmra.mxu3 %v3967_v42  ;;  %1380 = vmatpush.msrb.mxu0 %v3838_v24  ;;  %v135_v24 = vld [vmem:[#allocation7 + $0x260] sm:$0xff] }
  0xbe   :  { %1469 = vmatpush.msrb.mxu2 %v5308_v33  ;;  %1532 = vmatpush.msrb.mxu3 %v3772_v10 }
  0xbf   :  { %1221 = vmatpush.msra.mxu1 %v5309_v37  ;;  %1383 = vmatpush.msrb.mxu0 %v3849_v20  ;;  %v125_v37 = vld [vmem:[#allocation7 + $0x210] sm:$0xff] }
  0xc0   :  { %1223 = vmatmul.f32.vlgmr.msra.gmra.mxu1 %v3720_v55  ;;  %1473 = vmatpush.msrb.mxu2 %v5310_v25  ;;  %v5312_v55 = vand.u32 4294901760, %v3849_v20  ;;  %v136_v20 = vld [vmem:[#allocation7 + $0x268] sm:$0xff]  ;;  %v4234_v25 = vand.u32 4294901760, %v192_v32 }
  0xc1   :  { %1424 = vmatpush.msrb.mxu1 %v3772_v10  ;;  %1534 = vmatpush.msrb.mxu3 %v3791_v47  ;;  %v5313_v10 = vand.u32 4294901760, %v3868_v8 }
  0xc2   :  { %1386 = vmatpush.msrb.mxu0 %v3868_v8  ;;  %1477 = vmatpush.msrb.mxu2 %v5311_v53  ;;  %v134_v8 = vld [vmem:[#allocation7 + $0x258] sm:$0xff] }
  0xc3   :  { %1426 = vmatpush.msrb.mxu1 %v3791_v47  ;;  %1536 = vmatpush.msrb.mxu3 %v3808_v30  ;;  %v138_v47 = vld [vmem:[#allocation7 + $0x278] sm:$0xff] }
  0xc4   :  { %1389 = vmatpush.msrb.mxu0 %v3882_v18  ;;  %1481 = vmatpush.msrb.mxu2 %v5312_v55  ;;  %v4240_v55 = vand.u32 4294901760, %v126_v61 }
  0xc5   :  { %1428 = vmatpush.msrb.mxu1 %v3808_v30  ;;  %1538 = vmatpush.msrb.mxu3 %v3813_v11  ;;  %v5315_v30 = vand.u32 4294901760, %v3896_v49 }
  0xc6   :  { %1392 = vmatpush.msrb.mxu0 %v3896_v49  ;;  %1485 = vmatpush.msrb.mxu2 %v5313_v10  ;;  %v137_v49 = vld [vmem:[#allocation7 + $0x270] sm:$0xff] }
  0xc7   :  { %1430 = vmatpush.msrb.mxu1 %v3813_v11  ;;  %1540 = vmatpush.msrb.mxu3 %v3825_v51  ;;  %v4107_v11 = vand.u32 4294901760, %v137_v49 }
  0xc8   :  { %1395 = vmatpush.msrb.mxu0 %v3908_v16  ;;  %1489 = vmatpush.msrb.mxu2 %v5314_v57  ;;  %v4244_v57 = vsub.f32 %v128_v34, %v4214_v36 }
  0xc9   :  { %1432 = vmatpush.msrb.mxu1 %v3825_v51  ;;  %1542 = vmatpush.msrb.mxu3 %v3842_v44  ;;  %v4100_v51 = vand.u32 4294901760, %v138_v47  ;;  %v4127_v18 = vsub.f32 %v137_v49, %v4107_v11 }
  0xca   :  { %1398 = vmatpush.msrb.mxu0 %v3920_v28  ;;  %1493 = vmatpush.msrb.mxu2 %v5315_v30  ;;  %v132_v28 = vld [vmem:[#allocation7 + $0x248] sm:$0xff] }
  0xcb   :  { %1434 = vmatpush.msrb.mxu1 %v3842_v44  ;;  %1544 = vmatpush.msrb.mxu3 %v3857_v5  ;;  %v4114_v44 = vand.u32 4294901760, %v136_v20 }
  0xcc   :  { %1401 = vmatpush.msrb.mxu0 %v3933_v45  ;;  %1497 = vmatpush.msrb.mxu2 %v5316_v38 }
  0xcd   :  { %1436 = vmatpush.msrb.mxu1 %v3857_v5  ;;  %1546 = vmatpush.msrb.mxu3 %v3870_v31  ;;  %v4117_v5 = vsub.f32 %v138_v47, %v4100_v51  ;;  %v4138_v16 = vsub.f32 %v136_v20, %v4114_v44  ;;  %v4252_v47 = vand.u32 4294901760, %v125_v37  ;;  %v4256_v20 = vsub.f32 %v127_v52, %v4226_v41  ;;  %v153_v52 = vld [vmem:[#allocation7 + $0x2f0] sm:$0xff] }
  0xce   :  { %1404 = vmatpush.msrb.mxu0 %v3947_v58  ;;  %1501 = vmatpush.msrb.mxu2 %v1324_v62 }
  0xcf   :  { %1438 = vmatpush.msrb.mxu1 %v3870_v31  ;;  %1548 = vmatpush.msrb.mxu3 %v3884_v1  ;;  %v4124_v31 = vand.u32 4294901760, %v135_v24  ;;  %v1611_v58 = vand.u32 4294901760, %v4117_v5  ;;  %v5208_v34 = vand.u32 4294901760, %v4256_v20 }
  0xd0   :  { %1407 = vmatpush.msrb.mxu0 %v3960_v60  ;;  %1505 = vmatpush.msrb.mxu2 %v1330_v14  ;;  %v131_v14 = vld [vmem:[#allocation7 + $0x240] sm:$0xff]  ;;  %v4162_v60 = vand.u32 4294901760, %v132_v28 }
  0xd1   :  { %1440 = vmatpush.msrb.mxu1 %v3884_v1  ;;  %1550 = vmatpush.msrb.mxu3 %v3898_v0  ;;  %v133_v1 = vld [vmem:[#allocation7 + $0x250] sm:$0xff]  ;;  %v4149_v45 = vsub.f32 %v135_v24, %v4124_v31  ;;  %v124_v24 = vld [vmem:[#allocation7 + $0x208] sm:$0xff] }
  0xd2   :  { %1410 = vmatpush.msrb.mxu0 %v3978_v4  ;;  %1509 = vmatpush.msrb.mxu2 %v1336_v21  ;;  %v1623_v21 = vand.u32 4294901760, %v4138_v16 }
  0xd3   :  { %1442 = vmatpush.msrb.mxu1 %v3898_v0  ;;  %1552 = vmatpush.msrb.mxu3 %v3910_v50  ;;  %v4132_v0 = vand.u32 4294901760, %v134_v8  ;;  %v5218_v15 = vand.u32 4294901760, %v4149_v45 }
  0xd4   :  { %1413 = vmatpush.msrb.mxu0 %v3991_v13  ;;  %1513 = vmatpush.msrb.mxu2 %v1342_v29  ;;  %v130_v29 = vld [vmem:[#allocation7 + $0x238] sm:$0xff]  ;;  %v4175_v13 = vand.u32 4294901760, %v131_v14  ;;  %v1624_v48 = vsub.f32 %v4138_v16, %v1623_v21 }
  0xd5   :  { %1444 = vmatpush.msrb.mxu1 %v3910_v50  ;;  %1554 = vmatpush.msrb.mxu3 %v3922_v9  ;;  %v4143_v50 = vand.u32 4294901760, %v133_v1  ;;  %v4155_v62 = vsub.f32 %v134_v8, %v4132_v0  ;;  %v4186_v3 = vand.u32 4294901760, %v130_v29  ;;  %v1630_v17 = vsub.f32 %v4149_v45, %v5218_v15 }
  0xd6   :  { %1416 = vmatpush.msrb.mxu0 %v4005_v54  ;;  %1517 = vmatpush.msrb.mxu2 %v1348_v27  ;;  %v129_v54 = vld [vmem:[#allocation7 + $0x230] sm:$0xff]  ;;  %v1625_v23 = vand.u32 4294901760, %v1624_v48  ;;  %v4261_v8 = vsub.f32 %v192_v32, %v4234_v25 }
  0xd7   :  { %1446 = vmatpush.msrb.mxu1 %v3922_v9  ;;  %1556 = vmatpush.msrb.mxu3 %v3935_v19  ;;  %v1617_v9 = vand.u32 4294901760, %v4127_v18  ;;  %v4168_v4 = vsub.f32 %v133_v1, %v4143_v50  ;;  %v5217_v27 = vand.u32 4294901760, %v4155_v62  ;;  %v4199_v59 = vand.u32 4294901760, %v129_v54 }
  0xd8   :  { %1419 = vmatmul.f32.vlgmr.msrb.gmra.mxu0 %v3994_v39  ;;  %1521 = vmatpush.msrb.mxu2 %v1354_v7  ;;  %v4189_v7 = vsub.f32 %v132_v28, %v4162_v60  ;;  %v1631_v2 = vand.u32 4294901760, %v1630_v17  ;;  %v5221_v17 = vand.u32 4294901760, %v4261_v8 }
  0xd9   :  { %1569 = vmatpush.msra.mxu0 %v4100_v51  ;;  %1448 = vmatpush.msrb.mxu1 %v3935_v19  ;;  %v1612_v19 = vsub.f32 %v4117_v5, %v1611_v58  ;;  %v4230_v12 = vsub.f32 %v129_v54, %v4199_v59  ;;  %v123_v54 = vld [vmem:[#allocation7 + $0x200] sm:$0xff] }
  0xda   :  { %1558 = vmatpush.msrb.mxu3 %v3952_v43  ;;  %1525 = vmatpush.msrb.mxu2 %v1360_v6  ;;  %v4202_v6 = vsub.f32 %v131_v14, %v4175_v13  ;;  %v5214_v39 = vand.u32 4294901760, %v4189_v7  ;;  %v5209_v14 = vand.u32 4294901760, %v4244_v57 }
  0xdb   :  { %1571 = vmatpush.msra.mxu0 %v4107_v11  ;;  %1450 = vmatpush.msrb.mxu1 %v3952_v43  ;;  %v1618_v43 = vsub.f32 %v4127_v18, %v1617_v9  ;;  %v1613_v22 = vand.u32 4294901760, %v1612_v19  ;;  %v5210_v49 = vand.u32 4294901760, %v4230_v12  ;;  %v4269_v19 = vsub.f32 %v126_v61, %v4240_v55 }
  0xdc   :  { %1560 = vmatpush.msrb.mxu3 %v3965_v46  ;;  %1527 = vmatmul.f32.vlgmr.msrb.gmra.mxu2 %v3967_v42  ;;  %v5213_v26 = vand.u32 4294901760, %v4202_v6  ;;  %v1648_v53 = vsub.f32 %v4189_v7, %v5214_v39 }
  0xdd   :  { %1573 = vmatpush.msra.mxu0 %v4114_v44  ;;  %1712 = vmatpush.msra.mxu2 %v4117_v5  ;;  %v1666_v48 = vsub.f32 %v4230_v12, %v5210_v49  ;;  %v5211_v61 = vand.u32 4294901760, %v4269_v19  ;;  %v150_v49 = vld [vmem:[#allocation7 + $0x2d8] sm:$0xff] }
  0xde   :  { %1452 = vmatpush.msrb.mxu1 %v3965_v46  ;;  %1562 = vmatpush.msrb.mxu3 %v3980_v35  ;;  %v5215_v46 = vand.u32 4294901760, %v4168_v4  ;;  %v1654_v38 = vsub.f32 %v4202_v6, %v5213_v26  ;;  %v1649_v1 = vand.u32 4294901760, %v1648_v53  ;;  %v1678_v53 = vsub.f32 %v4256_v20, %v5208_v34 }
  0xdf   :  { %1564 = vmatmul.f32.vlgmr.msrb.gmra.mxu3 %v3967_v42  ;;  %1575 = vmatpush.msra.mxu0 %v4124_v31  ;;  %v1619_v42 = vand.u32 4294901760, %v1618_v43  ;;  %v4273_v43 = vand.u32 4294901760, %v124_v24  ;;  %v4339_v39 = vand.u32 4294901760, %v150_v49 }
  0xe0   :  { %1715 = vmatpush.msra.mxu2 %v4127_v18  ;;  %1765 = vmatpush.msra.mxu3 %v4100_v51  ;;  %v1642_v63 = vsub.f32 %v4168_v4, %v5215_v46 }
  0xe1   :  { %1454 = vmatpush.msrb.mxu1 %v3980_v35  ;;  %1577 = vmatpush.msra.mxu0 %v4132_v0  ;;  %v1636_v35 = vsub.f32 %v4155_v62, %v5217_v27 }
  0xe2   :  { %1458 = vmatmul.f32.vlgmr.msrb.gmra.mxu1 %v1261_v56  ;;  %1718 = vmatpush.msra.mxu2 %v4138_v16  ;;  %v4218_v56 = vsub.f32 %v130_v29, %v4186_v3  ;;  %v1643_v30 = vand.u32 4294901760, %v1642_v63  ;;  %v154_v29 = vld [vmem:[#allocation7 + $0x2f8] sm:$0xff]  ;;  %v4292_v63 = vand.u32 4294901760, %v123_v54 }
  0xe3   :  { %1614 = vmatpush.msra.mxu1 %v1613_v22  ;;  %1767 = vmatpush.msra.mxu3 %v4107_v11  ;;  %v1637_v33 = vand.u32 4294901760, %v1636_v35  ;;  %v1655_v22 = vand.u32 4294901760, %v1654_v38  ;;  %v4286_v35 = vand.u32 4294901760, %v154_v29  ;;  %v4305_v38 = vand.u32 4294901760, %v153_v52 }
  0xe4   :  { %1579 = vmatpush.msra.mxu0 %v4143_v50  ;;  %1721 = vmatpush.msra.mxu2 %v4149_v45  ;;  %v5212_v10 = vand.u32 4294901760, %v4218_v56  ;;  %5317 = vst [vmem:[#allocation13_spill] sm:$0xff] %v4292_v63  ;;  %v4320_v34 = vsub.f32 %v123_v54, %v4292_v63 }
  0xe5   :  { %1620 = vmatpush.msra.mxu1 %v1619_v42  ;;  %1769 = vmatpush.msra.mxu3 %v4114_v44  ;;  %v4281_v42 = vsub.f32 %v125_v37, %v4252_v47  ;;  %v1667_v37 = vand.u32 4294901760, %v1666_v48  ;;  %v1684_v48 = vsub.f32 %v4269_v19, %v5211_v61  ;;  %v4334_v61 = vsub.f32 %v153_v52, %v4305_v38 }
  0xe6   :  { %1581 = vmatpush.msra.mxu0 %v4162_v60  ;;  %1724 = vmatpush.msra.mxu2 %v4155_v62  ;;  %v1660_v28 = vsub.f32 %v4218_v56, %v5212_v10  ;;  %v5222_v46 = vand.u32 4294901760, %v4320_v34 }
  0xe7   :  { %1626 = vmatpush.msra.mxu1 %v1625_v23  ;;  %1771 = vmatpush.msra.mxu3 %v4124_v31  ;;  %v1672_v23 = vsub.f32 %v4244_v57, %v5209_v14  ;;  %v5223_v27 = vand.u32 4294901760, %v4334_v61 }
  0xe8   :  { %1583 = vmatpush.msra.mxu0 %v4175_v13  ;;  %1727 = vmatpush.msra.mxu2 %v4168_v4  ;;  %v1661_v32 = vand.u32 4294901760, %v1660_v28  ;;  %v4313_v28 = vsub.f32 %v154_v29, %v4286_v35 }
  0xe9   :  { %1632 = vmatpush.msra.mxu1 %v1631_v2  ;;  %1773 = vmatpush.msra.mxu3 %v4132_v0  ;;  %v4298_v2 = vsub.f32 %v124_v24, %v4273_v43  ;;  %v1603_v24 = vsub.f32 %v4261_v8, %v5221_v17  ;;  %v146_v17 = vld [vmem:[#allocation7 + $0x2b8] sm:$0xff]  ;;  %v1959_v5 = vsub.f32 %v4334_v61, %v5223_v27  ;;  %v5319_v27 = vand.u32 4294901760, %v4261_v8 }
  0xea   :  { %1585 = vmatpush.msra.mxu0 %v4186_v3  ;;  %1730 = vmatpush.msra.mxu2 %v4189_v7  ;;  %v5220_v26 = vand.u32 4294901760, %v4313_v28 }
  0xeb   :  { %1638 = vmatpush.msra.mxu1 %v1637_v33  ;;  %1775 = vmatpush.msra.mxu3 %v4143_v50  ;;  %v152_v33 = vld [vmem:[#allocation7 + $0x2e8] sm:$0xff]  ;;  %v5219_v29 = vand.u32 4294901760, %v4298_v2  ;;  %v1604_v10 = vand.u32 4294901760, %v1603_v24 }
  0xec   :  { %1587 = vmatpush.msra.mxu0 %v4199_v59  ;;  %1733 = vmatpush.msra.mxu2 %v4202_v6  ;;  %v4322_v14 = vand.u32 4294901760, %v152_v33  ;;  %v1953_v15 = vsub.f32 %v4313_v28, %v5220_v26 }
  0xed   :  { %1644 = vmatpush.msra.mxu1 %v1643_v30  ;;  %1777 = vmatpush.msra.mxu3 %v4162_v60  ;;  %v5216_v30 = vand.u32 4294901760, %v4281_v42  ;;  %v1696_v52 = vsub.f32 %v4298_v2, %v5219_v29  ;;  %v4363_v29 = vsub.f32 %v150_v49, %v4339_v39  ;;  %v145_v49 = vld [vmem:[#allocation7 + $0x2b0] sm:$0xff] }
  0xee   :  { %1589 = vmatpush.msra.mxu0 %v4214_v36  ;;  %1736 = vmatpush.msra.mxu2 %v4218_v56 }
  0xef   :  { %1650 = vmatpush.msra.mxu1 %v1649_v1  ;;  %1779 = vmatpush.msra.mxu3 %v4175_v13  ;;  %v151_v1 = vld [vmem:[#allocation7 + $0x2e0] sm:$0xff]  ;;  %v1690_v54 = vsub.f32 %v4281_v42, %v5216_v30  ;;  %v4344_v30 = vsub.f32 %v152_v33, %v4322_v14  ;;  %v1697_v26 = vand.u32 4294901760, %v1696_v52  ;;  %v1954_v52 = vand.u32 4294901760, %v1953_v15 }
  0xf0   :  { %1591 = vmatpush.msra.mxu0 %v4226_v41  ;;  %1739 = vmatpush.msra.mxu2 %v4230_v12 }
  0xf1   :  { %1656 = vmatpush.msra.mxu1 %v1655_v22  ;;  %1781 = vmatpush.msra.mxu3 %v4186_v3  ;;  %v1673_v22 = vand.u32 4294901760, %v1672_v23  ;;  %v1679_v23 = vand.u32 4294901760, %v1678_v53  ;;  %v1685_v53 = vand.u32 4294901760, %v1684_v48  ;;  %v1691_v48 = vand.u32 4294901760, %v1690_v54 }
  0xf2   :  { %1593 = vmatpush.msra.mxu0 %v4240_v55  ;;  %1742 = vmatpush.msra.mxu2 %v4244_v57 }
  0xf3   :  { %1662 = vmatpush.msra.mxu1 %v1661_v32  ;;  %1783 = vmatpush.msra.mxu3 %v4199_v59  ;;  %v4327_v32 = vand.u32 4294901760, %v151_v1 }
  0xf4   :  { %1595 = vmatpush.msra.mxu0 %v4252_v47  ;;  %1745 = vmatpush.msra.mxu2 %v4256_v20 }
  0xf5   :  { %1668 = vmatpush.msra.mxu1 %v1667_v37  ;;  %1785 = vmatpush.msra.mxu3 %v4214_v36  ;;  %v149_v37 = vld [vmem:[#allocation7 + $0x2d0] sm:$0xff]  ;;  %v4352_v24 = vsub.f32 %v151_v1, %v4327_v32  ;;  %v147_v1 = vld [vmem:[#allocation7 + $0x2c0] sm:$0xff] }
  0xf6   :  { %1597 = vmatpush.msra.mxu0 %v4273_v43  ;;  %1748 = vmatpush.msra.mxu2 %v4269_v19  ;;  %v4356_v33 = vand.u32 4294901760, %v149_v37 }
  0xf7   :  { %1674 = vmatpush.msra.mxu1 %v1673_v22  ;;  %1787 = vmatpush.msra.mxu3 %v4226_v41  ;;  %v148_v22 = vld [vmem:[#allocation7 + $0x2c8] sm:$0xff]  ;;  %v5318_v15 = vand.u32 4294901760, %v4352_v24 }
  0xf8   :  { %1599 = vmatpush.msra.mxu0 %v4292_v63  ;;  %1751 = vmatpush.msra.mxu2 %v4281_v42  ;;  %v4371_v54 = vand.u32 4294901760, %v148_v22 }
  0xf9   :  { %1680 = vmatpush.msra.mxu1 %v1679_v23  ;;  %1789 = vmatpush.msra.mxu3 %v4240_v55  ;;  %v1702_v23 = vsub.f32 %v4320_v34, %v5222_v46  ;;  %v1971_v16 = vsub.f32 %v4352_v24, %v5318_v15  ;;  %v5321_v15 = vand.u32 4294901760, %v4363_v29 }
  0xfa   :  { %1605 = vmatmul.f32.vlgmr.msra.gmra.mxu0 %v1604_v10  ;;  %1754 = vmatpush.msra.mxu2 %v4298_v2  ;;  %v5224_v10 = vand.u32 4294901760, %v4344_v30 }
  0xfb   :  { %1806 = vmatpush.msrb.mxu0 %v1611_v58  ;;  %1686 = vmatpush.msra.mxu1 %v1685_v53  ;;  %v4382_v58 = vsub.f32 %v149_v37, %v4356_v33  ;;  %v4384_v53 = vand.u32 4294901760, %v147_v1  ;;  %v1703_v18 = vand.u32 4294901760, %v1702_v23  ;;  %v4396_v37 = vsub.f32 %v148_v22, %v4371_v54  ;;  %v142_v22 = vld [vmem:[#allocation7 + $0x298] sm:$0xff] }
  0xfc   :  { %1791 = vmatpush.msra.mxu3 %v4252_v47  ;;  %1757 = vmatpush.msra.mxu2 %v4320_v34  ;;  %v5320_v23 = vand.u32 4294901760, %v4149_v45  ;;  %v5322_v45 = vand.u32 4294901760, %v4155_v62 }
  0xfd   :  { %1810 = vmatpush.msrb.mxu0 %v1617_v9  ;;  %1692 = vmatpush.msra.mxu1 %v1691_v48  ;;  %v1965_v9 = vsub.f32 %v4344_v30, %v5224_v10  ;;  %v4398_v48 = vand.u32 4294901760, %v146_v17  ;;  %v1960_v10 = vand.u32 4294901760, %v1959_v5  ;;  %v4410_v46 = vsub.f32 %v147_v1, %v4384_v53 }
  0xfe   :  { %1793 = vmatpush.msra.mxu3 %v4273_v43  ;;  %1760 = vmatmul.f32.vlgmr.msra.gmra.mxu2 %v4261_v8  ;;  %v143_v8 = vld [vmem:[#allocation7 + $0x2a0] sm:$0xff]  ;;  %v5226_v5 = vand.u32 4294901760, %v4396_v37  ;;  %v5323_v62 = vand.u32 4294901760, %v4382_v58 }
  0xff   :  { %1814 = vmatpush.msrb.mxu0 %v1623_v21  ;;  %1910 = vmatpush.msrb.mxu2 %v4286_v35  ;;  %v144_v21 = vld [vmem:[#allocation7 + $0x2a8] sm:$0xff]  ;;  %v4422_v1 = vsub.f32 %v146_v17, %v4398_v48 }
 0x100   :  { %1698 = vmatpush.msra.mxu1 %v1697_v26  ;;  %1795 = vmatpush.msra.mxu3 %v4292_v63  ;;  %v4412_v26 = vand.u32 4294901760, %v145_v49  ;;  %v1977_v63 = vsub.f32 %v4363_v29, %v5321_v15  ;;  %v4436_v15 = vand.u32 4294901760, %v143_v8 }
 0x101   :  { %1799 = vmatmul.f32.vlgmr.msra.gmra.mxu3 %v5319_v27  ;;  %1818 = vmatpush.msrb.mxu0 %v5320_v23  ;;  %v1966_v27 = vand.u32 4294901760, %v1965_v9  ;;  %v4424_v23 = vand.u32 4294901760, %v144_v21  ;;  %v141_v9 = vld [vmem:[#allocation7 + $0x290] sm:$0xff] }
 0x102   :  { %1912 = vmatpush.msrb.mxu2 %v4305_v38  ;;  %1955 = vmatpush.msrb.mxu3 %v1954_v52  ;;  %v1972_v52 = vand.u32 4294901760, %v1971_v16  ;;  %v4434_v17 = vsub.f32 %v145_v49, %v4412_v26  ;;  %v1978_v16 = vand.u32 4294901760, %v1977_v63 }
 0x103   :  { %1704 = vmatpush.msra.mxu1 %v1703_v18  ;;  %1822 = vmatpush.msrb.mxu0 %v5322_v45  ;;  %v1983_v18 = vsub.f32 %v4382_v58, %v5323_v62  ;;  %v5324_v45 = vand.u32 4294901760, %v4168_v4  ;;  %v4447_v49 = vsub.f32 %v144_v21, %v4424_v23  ;;  %v4449_v62 = vand.u32 4294901760, %v142_v22  ;;  %v139_v21 = vld [vmem:[#allocation7 + $0x280] sm:$0xff] }
 0x104   :  { %1706 = vmatmul.f32.vlgmr.msra.gmra.mxu1 %v4234_v25  ;;  %1914 = vmatpush.msrb.mxu2 %v4322_v14  ;;  %v5325_v4 = vand.u32 4294901760, %v4189_v7  ;;  %v5327_v7 = vand.u32 4294901760, %v4202_v6  ;;  %v5329_v6 = vand.u32 4294901760, %v4218_v56 }
 0x105   :  { %1873 = vmatpush.msrb.mxu1 %v4100_v51  ;;  %1961 = vmatpush.msrb.mxu3 %v1960_v10  ;;  %v1989_v51 = vsub.f32 %v4396_v37, %v5226_v5  ;;  %v1984_v63 = vand.u32 4294901760, %v1983_v18  ;;  %v4461_v5 = vsub.f32 %v143_v8, %v4436_v15  ;;  %v140_v10 = vld [vmem:[#allocation7 + $0x288] sm:$0xff]  ;;  %v4474_v8 = vsub.f32 %v142_v22, %v4449_v62 }
 0x106   :  { %1826 = vmatpush.msrb.mxu0 %v5324_v45  ;;  %1916 = vmatpush.msrb.mxu2 %v4327_v32 }
 0x107   :  { %1875 = vmatpush.msrb.mxu1 %v4107_v11  ;;  %1967 = vmatpush.msrb.mxu3 %v1966_v27  ;;  %v193_v11 = vperm.slane %v4210_v40, 5  ;;  %v5326_v27 = vand.u32 4294901760, %v4410_v46  ;;  %v2018_v22 = vand.u32 4294901760, %v4461_v5 }
 0x108   :  { %1830 = vmatpush.msrb.mxu0 %v5325_v4  ;;  %1918 = vmatpush.msrb.mxu2 %v4339_v39  ;;  %v4466_v4 = vand.u32 4294901760, %v141_v9 }
 0x109   :  { %1877 = vmatpush.msrb.mxu1 %v4114_v44  ;;  %1973 = vmatpush.msrb.mxu3 %v1972_v52  ;;  %v1995_v45 = vsub.f32 %v4410_v46, %v5326_v27  ;;  %v1990_v44 = vand.u32 4294901760, %v1989_v51  ;;  %v5328_v52 = vand.u32 4294901760, %v4422_v1  ;;  %v5330_v51 = vand.u32 4294901760, %v4434_v17 }
 0x10a   :  { %1834 = vmatpush.msrb.mxu0 %v5327_v7  ;;  %1920 = vmatpush.msrb.mxu2 %v4356_v33  ;;  %v4479_v7 = vand.u32 4294901760, %v140_v10  ;;  %v5331_v27 = vand.u32 4294901760, %v4230_v12  ;;  %v4492_v56 = vsub.f32 %v141_v9, %v4466_v4  ;;  %v5333_v12 = vand.u32 4294901760, %v4244_v57 }
 0x10b   :  { %1879 = vmatpush.msrb.mxu1 %v4124_v31  ;;  %1979 = vmatpush.msrb.mxu3 %v1978_v16  ;;  %v2001_v18 = vsub.f32 %v4422_v1, %v5328_v52  ;;  %v4481_v31 = vand.u32 4294901760, %v193_v11  ;;  %v1996_v16 = vand.u32 4294901760, %v1995_v45  ;;  %v2007_v52 = vsub.f32 %v4434_v17, %v5330_v51 }
 0x10c   :  { %1838 = vmatpush.msrb.mxu0 %v5329_v6  ;;  %1922 = vmatpush.msrb.mxu2 %v4371_v54  ;;  %v4494_v6 = vand.u32 4294901760, %v139_v21  ;;  %v2024_v51 = vand.u32 4294901760, %v4474_v8  ;;  %v4505_v9 = vsub.f32 %v140_v10, %v4479_v7  ;;  %v2030_v57 = vand.u32 4294901760, %v4492_v56 }
 0x10d   :  { %1881 = vmatpush.msrb.mxu1 %v4132_v0  ;;  %1985 = vmatpush.msrb.mxu3 %v1984_v63  ;;  %v2002_v0 = vand.u32 4294901760, %v2001_v18  ;;  %v5332_v63 = vand.u32 4294901760, %v4447_v49  ;;  %v5334_v18 = vand.u32 4294901760, %v4256_v20 }
 0x10e   :  { %1842 = vmatpush.msrb.mxu0 %v5331_v27  ;;  %1924 = vmatpush.msrb.mxu2 %v4384_v53  ;;  %v4508_v27 = vsub.f32 %v193_v11, %v4481_v31  ;;  %v4519_v10 = vsub.f32 %v139_v21, %v4494_v6  ;;  %v2025_v11 = vsub.f32 %v4474_v8, %v2024_v51  ;;  %v2036_v20 = vand.u32 4294901760, %v4505_v9 }
 0x10f   :  { %1883 = vmatpush.msrb.mxu1 %v4143_v50  ;;  %1991 = vmatpush.msrb.mxu3 %v1990_v44  ;;  %v2013_v45 = vsub.f32 %v4447_v49, %v5332_v63  ;;  %v2008_v50 = vand.u32 4294901760, %v2007_v52  ;;  %v2019_v44 = vsub.f32 %v4461_v5, %v2018_v22 }
 0x110   :  { %1846 = vmatpush.msrb.mxu0 %v5333_v12  ;;  %1926 = vmatpush.msrb.mxu2 %v4398_v48  ;;  %v1943_v52 = vand.u32 4294901760, %v4508_v27  ;;  %v2026_v63 = vand.u32 4294901760, %v2025_v11 }
 0x111   :  { %1885 = vmatpush.msrb.mxu1 %v4162_v60  ;;  %1997 = vmatpush.msrb.mxu3 %v1996_v16  ;;  %v2014_v60 = vand.u32 4294901760, %v2013_v45  ;;  %v5335_v16 = vand.u32 4294901760, %v4269_v19  ;;  %v2020_v21 = vand.u32 4294901760, %v2019_v44  ;;  %v2031_v19 = vsub.f32 %v4492_v56, %v2030_v57 }
 0x112   :  { %1850 = vmatpush.msrb.mxu0 %v5334_v18  ;;  %1928 = vmatpush.msrb.mxu2 %v4412_v26  ;;  %v5337_v45 = vand.u32 4294901760, %v4298_v2 }
 0x113   :  { %1887 = vmatpush.msrb.mxu1 %v4175_v13  ;;  %2003 = vmatpush.msrb.mxu3 %v2002_v0  ;;  %v5336_v13 = vand.u32 4294901760, %v4281_v42  ;;  %v2042_v0 = vand.u32 4294901760, %v4519_v10  ;;  %v1944_v42 = vsub.f32 %v4508_v27, %v1943_v52  ;;  %v2032_v2 = vand.u32 4294901760, %v2031_v19 }
 0x114   :  { %1854 = vmatpush.msrb.mxu0 %v5335_v16  ;;  %1930 = vmatpush.msrb.mxu2 %v4424_v23  ;;  %v161_v16 = vld [vmem:[#allocation7 + $0x330] sm:$0xff] }
 0x115   :  { %1889 = vmatpush.msrb.mxu1 %v4186_v3  ;;  %2009 = vmatpush.msrb.mxu3 %v2008_v50  ;;  %v2037_v3 = vsub.f32 %v4505_v9, %v2036_v20  ;;  %v2043_v12 = vsub.f32 %v4519_v10, %v2042_v0 }
 0x116   :  { %1858 = vmatpush.msrb.mxu0 %v5336_v13  ;;  %1932 = vmatpush.msrb.mxu2 %v4436_v15 }
 0x117   :  { %1891 = vmatpush.msrb.mxu1 %v4199_v59  ;;  %2015 = vmatpush.msrb.mxu3 %v2014_v60  ;;  %v5338_v59 = vand.u32 4294901760, %v4320_v34  ;;  %v2038_v50 = vand.u32 4294901760, %v2037_v3  ;;  %v2044_v34 = vand.u32 4294901760, %v2043_v12 }
 0x118   :  { %1862 = vmatpush.msrb.mxu0 %v5337_v45  ;;  %1934 = vmatpush.msrb.mxu2 %v4449_v62  ;;  %v4713_v45 = vand.u32 4294901760, %v161_v16 }
 0x119   :  { %1893 = vmatpush.msrb.mxu1 %v4214_v36  ;;  %2021 = vmatpush.msrb.mxu3 %v2020_v21  ;;  %v1945_v36 = vand.u32 4294901760, %v1944_v42  ;;  %v159_v42 = vld [vmem:[#allocation7 + $0x320] sm:$0xff] }
 0x11a   :  { %1866 = vmatpush.msrb.mxu0 %v5338_v59  ;;  %1936 = vmatpush.msrb.mxu2 %v4466_v4  ;;  %v194_v59 = vperm.slane %v4210_v40, 6  ;;  %v158_v40 = vld [vmem:[#allocation7 + $0x318] sm:$0xff] }
 0x11b   :  { %1895 = vmatpush.msrb.mxu1 %v4226_v41  ;;  %2027 = vmatpush.msrb.mxu3 %v2026_v63  ;;  %v5339_v41 = vand.u32 4294901760, %v4313_v28 }
 0x11c   :  { %1868 = vmatmul.f32.vlgmr.msrb.gmra.mxu0 %v4234_v25  ;;  %1938 = vmatpush.msrb.mxu2 %v4479_v7 }
 0x11d   :  { %2053 = vmatpush.msra.mxu0 %v4313_v28  ;;  %1897 = vmatpush.msrb.mxu1 %v4240_v55  ;;  %v5340_v55 = vand.u32 4294901760, %v4334_v61  ;;  %v5342_v28 = vand.u32 4294901760, %v4344_v30 }
 0x11e   :  { %2033 = vmatpush.msrb.mxu3 %v2032_v2  ;;  %1940 = vmatpush.msrb.mxu2 %v4494_v6 }
 0x11f   :  { %2056 = vmatpush.msra.mxu0 %v4334_v61  ;;  %1899 = vmatpush.msrb.mxu1 %v4252_v47  ;;  %v5341_v47 = vld [vmem:[#allocation13_spill] sm:$0xff]  ;;  %v5346_v61 = vand.u32 4294901760, %v4396_v37 }
 0x120   :  { %2039 = vmatpush.msrb.mxu3 %v2038_v50  ;;  %1946 = vmatmul.f32.vlgmr.msrb.gmra.mxu2 %v1945_v36 }
 0x121   :  { %2059 = vmatpush.msra.mxu0 %v4344_v30  ;;  %2147 = vmatpush.msra.mxu2 %v5339_v41  ;;  %v5348_v30 = vand.u32 4294901760, %v4422_v1 }
 0x122   :  { %1901 = vmatpush.msrb.mxu1 %v4273_v43  ;;  %2045 = vmatpush.msrb.mxu3 %v2044_v34  ;;  %v5343_v43 = vand.u32 4294901760, %v4352_v24  ;;  %v4738_v34 = vand.u32 4294901760, %v159_v42 }
 0x123   :  { %2047 = vmatmul.f32.vlgmr.msrb.gmra.mxu3 %v4481_v31  ;;  %2062 = vmatpush.msra.mxu0 %v4352_v24  ;;  %v168_v24 = vld [vmem:[#allocation7 + $0x368] sm:$0xff] }
 0x124   :  { %2151 = vmatpush.msra.mxu2 %v5340_v55  ;;  %2214 = vmatpush.msra.mxu3 %v4286_v35  ;;  %v4742_v55 = vsub.f32 %v161_v16, %v4713_v45 }
 0x125   :  { %1903 = vmatpush.msrb.mxu1 %v5341_v47  ;;  %2065 = vmatpush.msra.mxu0 %v4363_v29 }
 0x126   :  { %1905 = vmatmul.f32.vlgmr.msrb.gmra.mxu1 %v4234_v25  ;;  %2155 = vmatpush.msra.mxu2 %v5342_v28  ;;  %v5344_v25 = vand.u32 4294901760, %v4363_v29  ;;  %v157_v28 = vld [vmem:[#allocation7 + $0x310] sm:$0xff] }
 0x127   :  { %2106 = vmatpush.msra.mxu1 %v4286_v35  ;;  %2216 = vmatpush.msra.mxu3 %v4305_v38  ;;  %v5345_v35 = vand.u32 4294901760, %v4382_v58 }
 0x128   :  { %2068 = vmatpush.msra.mxu0 %v4382_v58  ;;  %2159 = vmatpush.msra.mxu2 %v5343_v43  ;;  %v4628_v58 = vand.u32 4294901760, %v168_v24  ;;  %v4746_v43 = vand.u32 4294901760, %v194_v59 }
 0x129   :  { %2108 = vmatpush.msra.mxu1 %v4305_v38  ;;  %2218 = vmatpush.msra.mxu3 %v4322_v14  ;;  %v170_v38 = vld [vmem:[#allocation7 + $0x378] sm:$0xff] }
 0x12a   :  { %2071 = vmatpush.msra.mxu0 %v4396_v37  ;;  %2163 = vmatpush.msra.mxu2 %v5344_v25  ;;  %v4614_v29 = vand.u32 4294901760, %v170_v38  ;;  %v166_v37 = vld [vmem:[#allocation7 + $0x358] sm:$0xff] }
 0x12b   :  { %2110 = vmatpush.msra.mxu1 %v4322_v14  ;;  %2220 = vmatpush.msra.mxu3 %v4327_v32  ;;  %v5347_v14 = vand.u32 4294901760, %v4410_v46 }
 0x12c   :  { %2074 = vmatpush.msra.mxu0 %v4410_v46  ;;  %2167 = vmatpush.msra.mxu2 %v5345_v35  ;;  %v169_v46 = vld [vmem:[#allocation7 + $0x370] sm:$0xff]  ;;  %v4752_v35 = vand.u32 4294901760, %v158_v40 }
 0x12d   :  { %2112 = vmatpush.msra.mxu1 %v4327_v32  ;;  %2222 = vmatpush.msra.mxu3 %v4339_v39  ;;  %v5350_v32 = vand.u32 4294901760, %v4447_v49 }
 0x12e   :  { %2077 = vmatpush.msra.mxu0 %v4422_v1  ;;  %2171 = vmatpush.msra.mxu2 %v5346_v61  ;;  %v4646_v1 = vand.u32 4294901760, %v166_v37 }
 0x12f   :  { %2114 = vmatpush.msra.mxu1 %v4339_v39  ;;  %2224 = vmatpush.msra.mxu3 %v4356_v33  ;;  %v5349_v39 = vand.u32 4294901760, %v4434_v17 }
 0x130   :  { %2080 = vmatpush.msra.mxu0 %v4434_v17  ;;  %2175 = vmatpush.msra.mxu2 %v5347_v14  ;;  %v4652_v17 = vsub.f32 %v168_v24, %v4628_v58  ;;  %v156_v24 = vld [vmem:[#allocation7 + $0x308] sm:$0xff] }
 0x131   :  { %2116 = vmatpush.msra.mxu1 %v4356_v33  ;;  %2226 = vmatpush.msra.mxu3 %v4371_v54  ;;  %v4621_v33 = vand.u32 4294901760, %v169_v46 }
 0x132   :  { %2083 = vmatpush.msra.mxu0 %v4447_v49  ;;  %2179 = vmatpush.msra.mxu2 %v5348_v30  ;;  %v2305_v44 = vand.u32 4294901760, %v4652_v17 }
 0x133   :  { %2118 = vmatpush.msra.mxu1 %v4371_v54  ;;  %2228 = vmatpush.msra.mxu3 %v4384_v53  ;;  %v167_v54 = vld [vmem:[#allocation7 + $0x360] sm:$0xff] }
 0x134   :  { %2086 = vmatpush.msra.mxu0 %v4461_v5  ;;  %2183 = vmatpush.msra.mxu2 %v5349_v39  ;;  %v165_v5 = vld [vmem:[#allocation7 + $0x350] sm:$0xff]  ;;  %v2306_v21 = vsub.f32 %v4652_v17, %v2305_v44  ;;  %v4764_v39 = vand.u32 4294901760, %v157_v28 }
 0x135   :  { %2120 = vmatpush.msra.mxu1 %v4384_v53  ;;  %2230 = vmatpush.msra.mxu3 %v4398_v48  ;;  %v4631_v53 = vsub.f32 %v170_v38, %v4614_v29  ;;  %v4657_v49 = vand.u32 4294901760, %v165_v5 }
 0x136   :  { %2089 = vmatpush.msra.mxu0 %v4474_v8  ;;  %2187 = vmatpush.msra.mxu2 %v5350_v32  ;;  %v164_v8 = vld [vmem:[#allocation7 + $0x348] sm:$0xff]  ;;  %v2307_v2 = vand.u32 4294901760, %v2306_v21  ;;  %v4768_v32 = vsub.f32 %v159_v42, %v4738_v34 }
 0x137   :  { %2122 = vmatpush.msra.mxu1 %v4398_v48  ;;  %2232 = vmatpush.msra.mxu3 %v4412_v26  ;;  %v4638_v48 = vand.u32 4294901760, %v167_v54  ;;  %v4682_v18 = vsub.f32 %v165_v5, %v4657_v49 }
 0x138   :  { %2092 = vmatpush.msra.mxu0 %v4492_v56  ;;  %2191 = vmatpush.msra.mxu2 %v2018_v22  ;;  %v4669_v56 = vsub.f32 %v166_v37, %v4646_v1  ;;  %v5227_v21 = vand.u32 4294901760, %v4768_v32 }
 0x139   :  { %2124 = vmatpush.msra.mxu1 %v4412_v26  ;;  %2234 = vmatpush.msra.mxu3 %v4424_v23  ;;  %v4641_v26 = vsub.f32 %v169_v46, %v4621_v33  ;;  %v4663_v22 = vsub.f32 %v167_v54, %v4638_v48  ;;  %v5230_v46 = vand.u32 4294901760, %v4742_v55  ;;  %v4773_v54 = vsub.f32 %v194_v59, %v4746_v43 }
 0x13a   :  { %2095 = vmatpush.msra.mxu0 %v4505_v9  ;;  %2195 = vmatpush.msra.mxu2 %v2024_v51  ;;  %v163_v51 = vld [vmem:[#allocation7 + $0x340] sm:$0xff]  ;;  %v4676_v9 = vand.u32 4294901760, %v164_v8  ;;  %v5236_v11 = vand.u32 4294901760, %v4669_v56 }
 0x13b   :  { %2126 = vmatpush.msra.mxu1 %v4424_v23  ;;  %2236 = vmatpush.msra.mxu3 %v4436_v15  ;;  %v2293_v23 = vand.u32 4294901760, %v4631_v53  ;;  %v5239_v60 = vand.u32 4294901760, %v4663_v22 }
 0x13c   :  { %2098 = vmatpush.msra.mxu0 %v4519_v10  ;;  %2199 = vmatpush.msra.mxu2 %v2030_v57  ;;  %v162_v57 = vld [vmem:[#allocation7 + $0x338] sm:$0xff]  ;;  %v4689_v10 = vand.u32 4294901760, %v163_v51  ;;  %v4703_v19 = vsub.f32 %v164_v8, %v4676_v9 }
 0x13d   :  { %2128 = vmatpush.msra.mxu1 %v4436_v15  ;;  %2238 = vmatpush.msra.mxu3 %v4449_v62  ;;  %v2299_v15 = vand.u32 4294901760, %v4641_v26  ;;  %v4700_v13 = vand.u32 4294901760, %v162_v57  ;;  %v2312_v63 = vsub.f32 %v4663_v22, %v5239_v60  ;;  %v178_v60 = vld [vmem:[#allocation7 + $0x3b8] sm:$0xff] }
 0x13e   :  { %2101 = vmatmul.f32.vlgmr.msra.gmra.mxu0 %v4508_v27  ;;  %2203 = vmatpush.msra.mxu2 %v2036_v20  ;;  %v4716_v3 = vsub.f32 %v163_v51, %v4689_v10  ;;  %v5233_v50 = vand.u32 4294901760, %v4703_v19  ;;  %v4781_v51 = vsub.f32 %v158_v40, %v4752_v35 }
 0x13f   :  { %2251 = vmatpush.msrb.mxu0 %v4614_v29  ;;  %2130 = vmatpush.msra.mxu1 %v4449_v62  ;;  %v2294_v62 = vsub.f32 %v4631_v53, %v2293_v23  ;;  %v4730_v27 = vsub.f32 %v162_v57, %v4700_v13  ;;  %v2313_v36 = vand.u32 4294901760, %v2312_v63  ;;  %v4785_v57 = vand.u32 4294901760, %v156_v24 }
 0x140   :  { %2240 = vmatpush.msra.mxu3 %v4466_v4  ;;  %2207 = vmatpush.msra.mxu2 %v2042_v0  ;;  %v160_v0 = vld [vmem:[#allocation7 + $0x328] sm:$0xff]  ;;  %v5232_v41 = vand.u32 4294901760, %v4716_v3  ;;  %v2330_v25 = vsub.f32 %v4703_v19, %v5233_v50 }
 0x141   :  { %2253 = vmatpush.msrb.mxu0 %v4621_v33  ;;  %2132 = vmatpush.msra.mxu1 %v4466_v4  ;;  %v2300_v4 = vsub.f32 %v4641_v26, %v2299_v15  ;;  %v2295_v20 = vand.u32 4294901760, %v2294_v62  ;;  %v4726_v12 = vand.u32 4294901760, %v160_v0  ;;  %v5231_v61 = vand.u32 4294901760, %v4730_v27  ;;  %v186_v62 = vld [vmem:[#allocation7 + $0x3f8] sm:$0xff] }
 0x142   :  { %2242 = vmatpush.msra.mxu3 %v4479_v7  ;;  %2209 = vmatmul.f32.vlgmr.msra.gmra.mxu2 %v4481_v31  ;;  %v2336_v38 = vsub.f32 %v4716_v3, %v5232_v41  ;;  %v2331_v37 = vand.u32 4294901760, %v2330_v25  ;;  %v4798_v63 = vand.u32 4294901760, %v186_v62  ;;  %v4810_v40 = vsub.f32 %v156_v24, %v4785_v57 }
 0x143   :  { %2255 = vmatpush.msrb.mxu0 %v4628_v58  ;;  %2394 = vmatpush.msrb.mxu2 %v4631_v53  ;;  %v4756_v14 = vsub.f32 %v160_v0, %v4726_v12  ;;  %v2342_v5 = vsub.f32 %v4730_v27, %v5231_v61  ;;  %v4793_v0 = vsub.f32 %v157_v28, %v4764_v39 }
 0x144   :  { %2134 = vmatpush.msra.mxu1 %v4479_v7  ;;  %2244 = vmatpush.msra.mxu3 %v4494_v6  ;;  %v5235_v7 = vand.u32 4294901760, %v4682_v18  ;;  %v2337_v16 = vand.u32 4294901760, %v2336_v38  ;;  %v2360_v28 = vsub.f32 %v4768_v32, %v5227_v21  ;;  %v183_v38 = vld [vmem:[#allocation7 + $0x3e0] sm:$0xff] }
 0x145   :  { %2246 = vmatmul.f32.vlgmr.msra.gmra.mxu3 %v4481_v31  ;;  %2257 = vmatpush.msrb.mxu0 %v4638_v48  ;;  %v2301_v31 = vand.u32 4294901760, %v2300_v4  ;;  %v5228_v8 = vand.u32 4294901760, %v4756_v14  ;;  %v155_v4 = vld [vmem:[#allocation7 + $0x300] sm:$0xff]  ;;  %v2343_v42 = vand.u32 4294901760, %v2342_v5  ;;  %v5234_v25 = vand.u32 4294901760, %v4793_v0 }
 0x146   :  { %2397 = vmatpush.msrb.mxu2 %v4641_v26  ;;  %2447 = vmatpush.msrb.mxu3 %v4614_v29 }
 0x147   :  { %2136 = vmatpush.msra.mxu1 %v4494_v6  ;;  %2259 = vmatpush.msrb.mxu0 %v4646_v1  ;;  %v2318_v6 = vsub.f32 %v4669_v56, %v5236_v11  ;;  %v2354_v59 = vsub.f32 %v4756_v14, %v5228_v8  ;;  %v182_v8 = vld [vmem:[#allocation7 + $0x3d8] sm:$0xff] }
 0x148   :  { %2140 = vmatmul.f32.vlgmr.msra.gmra.mxu1 %v1943_v52  ;;  %2400 = vmatpush.msrb.mxu2 %v4652_v17  ;;  %v2324_v52 = vsub.f32 %v4682_v18, %v5235_v7  ;;  %v4851_v41 = vand.u32 4294901760, %v182_v8 }
 0x149   :  { %2296 = vmatpush.msrb.mxu1 %v2295_v20  ;;  %2449 = vmatpush.msrb.mxu3 %v4621_v33  ;;  %v2319_v47 = vand.u32 4294901760, %v2318_v6  ;;  %v2348_v20 = vsub.f32 %v4742_v55, %v5230_v46  ;;  %v185_v6 = vld [vmem:[#allocation7 + $0x3f0] sm:$0xff]  ;;  %v2355_v5 = vand.u32 4294901760, %v2354_v59  ;;  %v2361_v59 = vand.u32 4294901760, %v2360_v28 }
 0x14a   :  { %2261 = vmatpush.msrb.mxu0 %v4657_v49  ;;  %2403 = vmatpush.msrb.mxu2 %v4663_v22  ;;  %v2325_v30 = vand.u32 4294901760, %v2324_v52  ;;  %v5229_v52 = vand.u32 4294901760, %v4781_v51 }
 0x14b   :  { %2302 = vmatpush.msrb.mxu1 %v2301_v31  ;;  %2451 = vmatpush.msrb.mxu3 %v4628_v58  ;;  %v5241_v31 = vand.u32 4294901760, %v4773_v54 }
 0x14c   :  { %2263 = vmatpush.msrb.mxu0 %v4676_v9  ;;  %2406 = vmatpush.msrb.mxu2 %v4669_v56 }
 0x14d   :  { %2308 = vmatpush.msrb.mxu1 %v2307_v2  ;;  %2453 = vmatpush.msrb.mxu3 %v4638_v48  ;;  %v4804_v2 = vand.u32 4294901760, %v155_v4  ;;  %v2285_v24 = vsub.f32 %v4773_v54, %v5241_v31  ;;  %v177_v31 = vld [vmem:[#allocation7 + $0x3b0] sm:$0xff] }
 0x14e   :  { %2265 = vmatpush.msrb.mxu0 %v4689_v10  ;;  %2409 = vmatpush.msrb.mxu2 %v4682_v18 }
 0x14f   :  { %2314 = vmatpush.msrb.mxu1 %v2313_v36  ;;  %2455 = vmatpush.msrb.mxu3 %v4646_v1  ;;  %v184_v36 = vld [vmem:[#allocation7 + $0x3e8] sm:$0xff]  ;;  %v2286_v46 = vand.u32 4294901760, %v2285_v24 }
 0x150   :  { %2267 = vmatpush.msrb.mxu0 %v4700_v13  ;;  %2412 = vmatpush.msrb.mxu2 %v4703_v19  ;;  %v4834_v21 = vand.u32 4294901760, %v184_v36 }
 0x151   :  { %2320 = vmatpush.msrb.mxu1 %v2319_v47  ;;  %2457 = vmatpush.msrb.mxu3 %v4657_v49  ;;  %v2349_v47 = vand.u32 4294901760, %v2348_v20  ;;  %v4832_v20 = vsub.f32 %v155_v4, %v4804_v2  ;;  %v2372_v4 = vsub.f32 %v4793_v0, %v5234_v25 }
 0x152   :  { %2269 = vmatpush.msrb.mxu0 %v4713_v45  ;;  %2415 = vmatpush.msrb.mxu2 %v4716_v3  ;;  %v4856_v25 = vsub.f32 %v184_v36, %v4834_v21 }
 0x153   :  { %2326 = vmatpush.msrb.mxu1 %v2325_v30  ;;  %2459 = vmatpush.msrb.mxu3 %v4676_v9  ;;  %v4817_v30 = vand.u32 4294901760, %v185_v6  ;;  %v5240_v50 = vand.u32 4294901760, %v4832_v20 }
 0x154   :  { %2271 = vmatpush.msrb.mxu0 %v4726_v12  ;;  %2418 = vmatpush.msrb.mxu2 %v4730_v27 }
 0x155   :  { %2332 = vmatpush.msrb.mxu1 %v2331_v37  ;;  %2461 = vmatpush.msrb.mxu3 %v4689_v10  ;;  %v4825_v37 = vsub.f32 %v186_v62, %v4798_v63  ;;  %v5237_v62 = vand.u32 4294901760, %v4810_v40 }
 0x156   :  { %2273 = vmatpush.msrb.mxu0 %v4738_v34  ;;  %2421 = vmatpush.msrb.mxu2 %v4742_v55 }
 0x157   :  { %2338 = vmatpush.msrb.mxu1 %v2337_v16  ;;  %2463 = vmatpush.msrb.mxu3 %v4700_v13  ;;  %v2366_v16 = vsub.f32 %v4781_v51, %v5229_v52  ;;  %v4846_v52 = vsub.f32 %v185_v6, %v4817_v30  ;;  %v5238_v61 = vand.u32 4294901760, %v4825_v37  ;;  %v2378_v6 = vsub.f32 %v4810_v40, %v5237_v62 }
 0x158   :  { %2275 = vmatpush.msrb.mxu0 %v4752_v35  ;;  %2424 = vmatpush.msrb.mxu2 %v4756_v14  ;;  %v4875_v62 = vsub.f32 %v182_v8, %v4851_v41 }
 0x159   :  { %2344 = vmatpush.msrb.mxu1 %v2343_v42  ;;  %2465 = vmatpush.msrb.mxu3 %v4713_v45  ;;  %v4839_v42 = vand.u32 4294901760, %v183_v38  ;;  %v2367_v28 = vand.u32 4294901760, %v2366_v16  ;;  %v2373_v16 = vand.u32 4294901760, %v2372_v4  ;;  %v5243_v7 = vand.u32 4294901760, %v4846_v52 }
 0x15a   :  { %2277 = vmatpush.msrb.mxu0 %v4764_v39  ;;  %2427 = vmatpush.msrb.mxu2 %v4768_v32  ;;  %v2635_v11 = vsub.f32 %v4825_v37, %v5238_v61  ;;  %v2379_v61 = vand.u32 4294901760, %v2378_v6 }
 0x15b   :  { %5351 = vst [vmem:[#allocation12_spill] sm:$0xff] %v4839_v42  ;;  %2350 = vmatpush.msrb.mxu1 %v2349_v47  ;;  %2467 = vmatpush.msrb.mxu3 %v4726_v12  ;;  %v181_v47 = vld [vmem:[#allocation7 + $0x3d0] sm:$0xff]  ;;  %v4864_v24 = vsub.f32 %v183_v38, %v4839_v42  ;;  %v179_v38 = vld [vmem:[#allocation7 + $0x3c0] sm:$0xff]  ;;  %v2641_v53 = vsub.f32 %v4846_v52, %v5243_v7 }
 0x15c   :  { %2279 = vmatpush.msrb.mxu0 %v4785_v57  ;;  %2430 = vmatpush.msrb.mxu2 %v4781_v51  ;;  %v4868_v36 = vand.u32 4294901760, %v181_v47  ;;  %v2636_v6 = vand.u32 4294901760, %v2635_v11  ;;  %v5352_v11 = vand.u32 4294901760, %v4773_v54 }
 0x15d   :  { %2356 = vmatpush.msrb.mxu1 %v2355_v5  ;;  %2469 = vmatpush.msrb.mxu3 %v4738_v34  ;;  %v180_v5 = vld [vmem:[#allocation7 + $0x3c8] sm:$0xff]  ;;  %v5244_v8 = vand.u32 4294901760, %v4864_v24 }
 0x15e   :  { %2281 = vmatpush.msrb.mxu0 %v4804_v2  ;;  %2433 = vmatpush.msrb.mxu2 %v4793_v0  ;;  %v4883_v4 = vand.u32 4294901760, %v180_v5 }
 0x15f   :  { %2362 = vmatpush.msrb.mxu1 %v2361_v59  ;;  %2471 = vmatpush.msrb.mxu3 %v4752_v35  ;;  %v2384_v59 = vsub.f32 %v4832_v20, %v5240_v50  ;;  %v5245_v50 = vand.u32 4294901760, %v4875_v62  ;;  %v2653_v17 = vsub.f32 %v4864_v24, %v5244_v8 }
 0x160   :  { %2287 = vmatmul.f32.vlgmr.msrb.gmra.mxu0 %v2286_v46  ;;  %2436 = vmatpush.msrb.mxu2 %v4810_v40  ;;  %v5242_v46 = vand.u32 4294901760, %v4856_v25 }
 0x161   :  { %2488 = vmatpush.msra.mxu0 %v2293_v23  ;;  %2368 = vmatpush.msrb.mxu1 %v2367_v28  ;;  %v4894_v23 = vsub.f32 %v181_v47, %v4868_v36  ;;  %v4896_v28 = vand.u32 4294901760, %v179_v38  ;;  %v2385_v26 = vand.u32 4294901760, %v2384_v59  ;;  %v4908_v47 = vsub.f32 %v180_v5, %v4883_v4  ;;  %v174_v5 = vld [vmem:[#allocation7 + $0x398] sm:$0xff] }
 0x162   :  { %2473 = vmatpush.msrb.mxu3 %v4764_v39  ;;  %2439 = vmatpush.msrb.mxu2 %v4832_v20  ;;  %v5353_v59 = vand.u32 4294901760, %v4663_v22  ;;  %v2659_v8 = vsub.f32 %v4875_v62, %v5245_v50  ;;  %v5354_v22 = vand.u32 4294901760, %v4669_v56  ;;  %v5356_v50 = vand.u32 4294901760, %v4682_v18 }
 0x163   :  { %2492 = vmatpush.msra.mxu0 %v2299_v15  ;;  %2374 = vmatpush.msrb.mxu1 %v2373_v16  ;;  %v2647_v15 = vsub.f32 %v4856_v25, %v5242_v46  ;;  %v4910_v16 = vand.u32 4294901760, %v178_v60  ;;  %v2642_v46 = vand.u32 4294901760, %v2641_v53  ;;  %v4922_v7 = vsub.f32 %v179_v38, %v4896_v28 }
 0x164   :  { %2475 = vmatpush.msrb.mxu3 %v4785_v57  ;;  %2442 = vmatmul.f32.vlgmr.msrb.gmra.mxu2 %v4773_v54  ;;  %v175_v54 = vld [vmem:[#allocation7 + $0x3a0] sm:$0xff]  ;;  %v5355_v56 = vand.u32 4294901760, %v4894_v23  ;;  %v5357_v18 = vand.u32 4294901760, %v4703_v19  ;;  %v5359_v19 = vand.u32 4294901760, %v4716_v3  ;;  %v5361_v3 = vand.u32 4294901760, %v4730_v27 }
 0x165   :  { %2496 = vmatpush.msra.mxu0 %v2305_v44  ;;  %2592 = vmatpush.msra.mxu2 %v4798_v63  ;;  %v176_v44 = vld [vmem:[#allocation7 + $0x3a8] sm:$0xff]  ;;  %v2648_v53 = vand.u32 4294901760, %v2647_v15  ;;  %v4934_v38 = vsub.f32 %v178_v60, %v4910_v16  ;;  %v173_v15 = vld [vmem:[#allocation7 + $0x390] sm:$0xff] }
 0x166   :  { %2380 = vmatpush.msrb.mxu1 %v2379_v61  ;;  %2477 = vmatpush.msrb.mxu3 %v4804_v2  ;;  %v4924_v61 = vand.u32 4294901760, %v177_v31 }
 0x167   :  { %2481 = vmatmul.f32.vlgmr.msrb.gmra.mxu3 %v5352_v11  ;;  %2500 = vmatpush.msra.mxu0 %v5353_v59  ;;  %v5246_v11 = vand.u32 4294901760, %v4908_v47  ;;  %v4936_v59 = vand.u32 4294901760, %v176_v44 }
 0x168   :  { %2594 = vmatpush.msra.mxu2 %v4817_v30  ;;  %2637 = vmatpush.msra.mxu3 %v2636_v6  ;;  %v2654_v6 = vand.u32 4294901760, %v2653_v17  ;;  %v4946_v60 = vsub.f32 %v177_v31, %v4924_v61  ;;  %v2660_v17 = vand.u32 4294901760, %v2659_v8 }
 0x169   :  { %2386 = vmatpush.msrb.mxu1 %v2385_v26  ;;  %2504 = vmatpush.msra.mxu0 %v5354_v22  ;;  %v2665_v26 = vsub.f32 %v4894_v23, %v5355_v56  ;;  %v4948_v22 = vand.u32 4294901760, %v175_v54  ;;  %v4959_v31 = vsub.f32 %v176_v44, %v4936_v59  ;;  %v4961_v56 = vand.u32 4294901760, %v174_v5 }
 0x16a   :  { %2388 = vmatmul.f32.vlgmr.msrb.gmra.mxu1 %v4746_v43  ;;  %2596 = vmatpush.msra.mxu2 %v4834_v21  ;;  %v2688_v44 = vand.u32 4294901760, %v4946_v60 }
 0x16b   :  { %2555 = vmatpush.msra.mxu1 %v4614_v29  ;;  %2643 = vmatpush.msra.mxu3 %v2642_v46  ;;  %v2671_v29 = vsub.f32 %v4908_v47, %v5246_v11  ;;  %v2666_v8 = vand.u32 4294901760, %v2665_v26  ;;  %v4972_v46 = vsub.f32 %v175_v54, %v4948_v22  ;;  %v4985_v54 = vsub.f32 %v174_v5, %v4961_v56 }
 0x16c   :  { %2508 = vmatpush.msra.mxu0 %v5356_v50  ;;  %2598 = vmatpush.msra.mxu2 %v4839_v42  ;;  %v2976_v50 = vld [vmem:[#allocation2] sm:$0xff]  ;;  %v172_v42 = vld [vmem:[#allocation7 + $0x388] sm:$0xff] }
 0x16d   :  { %2557 = vmatpush.msra.mxu1 %v4621_v33  ;;  %2649 = vmatpush.msra.mxu3 %v2648_v53  ;;  %v195_v33 = vperm.slane %v2976_v50, 7  ;;  %v5358_v53 = vand.u32 4294901760, %v4922_v7  ;;  %v2694_v50 = vand.u32 4294901760, %v4959_v31  ;;  %v2700_v5 = vand.u32 4294901760, %v4972_v46 }
 0x16e   :  { %2512 = vmatpush.msra.mxu0 %v5357_v18  ;;  %2600 = vmatpush.msra.mxu2 %v4851_v41  ;;  %v4977_v18 = vand.u32 4294901760, %v173_v15 }
 0x16f   :  { %2559 = vmatpush.msra.mxu1 %v4628_v58  ;;  %2655 = vmatpush.msra.mxu3 %v2654_v6  ;;  %v2677_v11 = vsub.f32 %v4922_v7, %v5358_v53  ;;  %v2672_v58 = vand.u32 4294901760, %v2671_v29  ;;  %v5360_v6 = vand.u32 4294901760, %v4934_v38  ;;  %v171_v53 = vld [vmem:[#allocation7 + $0x380] sm:$0xff]  ;;  %v2689_v29 = vsub.f32 %v4946_v60, %v2688_v44 }
 0x170   :  { %2516 = vmatpush.msra.mxu0 %v5359_v19  ;;  %2602 = vmatpush.msra.mxu2 %v4868_v36  ;;  %v4990_v19 = vand.u32 4294901760, %v172_v42  ;;  %v5003_v27 = vsub.f32 %v173_v15, %v4977_v18 }
 0x171   :  { %2561 = vmatpush.msra.mxu1 %v4638_v48  ;;  %2661 = vmatpush.msra.mxu3 %v2660_v17  ;;  %v2683_v26 = vsub.f32 %v4934_v38, %v5360_v6  ;;  %v4992_v48 = vand.u32 4294901760, %v195_v33  ;;  %v2678_v17 = vand.u32 4294901760, %v2677_v11  ;;  %v5362_v6 = vand.u32 4294901760, %v4742_v55 }
 0x172   :  { %2520 = vmatpush.msra.mxu0 %v5361_v3  ;;  %2604 = vmatpush.msra.mxu2 %v4883_v4  ;;  %v5005_v3 = vand.u32 4294901760, %v171_v53  ;;  %v2695_v11 = vsub.f32 %v4959_v31, %v2694_v50  ;;  %v5363_v55 = vand.u32 4294901760, %v4756_v14  ;;  %v5016_v15 = vsub.f32 %v172_v42, %v4990_v19 }
 0x173   :  { %2563 = vmatpush.msra.mxu1 %v4646_v1  ;;  %2667 = vmatpush.msra.mxu3 %v2666_v8  ;;  %v2684_v1 = vand.u32 4294901760, %v2683_v26  ;;  %v2706_v8 = vand.u32 4294901760, %v4985_v54  ;;  %v5364_v26 = vand.u32 4294901760, %v4768_v32  ;;  %v2712_v14 = vand.u32 4294901760, %v5003_v27 }
 0x174   :  { %2524 = vmatpush.msra.mxu0 %v5362_v6  ;;  %2606 = vmatpush.msra.mxu2 %v4896_v28  ;;  %v5019_v6 = vsub.f32 %v195_v33, %v4992_v48  ;;  %v5030_v42 = vsub.f32 %v171_v53, %v5005_v3  ;;  %v2718_v32 = vand.u32 4294901760, %v5016_v15 }
 0x175   :  { %2565 = vmatpush.msra.mxu1 %v4657_v49  ;;  %2673 = vmatpush.msra.mxu3 %v2672_v58  ;;  %v2690_v49 = vand.u32 4294901760, %v2689_v29  ;;  %v2701_v58 = vsub.f32 %v4972_v46, %v2700_v5  ;;  %v2707_v33 = vsub.f32 %v4985_v54, %v2706_v8 }
 0x176   :  { %2528 = vmatpush.msra.mxu0 %v5363_v55  ;;  %2608 = vmatpush.msra.mxu2 %v4910_v16  ;;  %v2625_v29 = vand.u32 4294901760, %v5019_v6  ;;  %v5367_v55 = vand.u32 4294901760, %v4810_v40 }
 0x177   :  { %2567 = vmatpush.msra.mxu1 %v4676_v9  ;;  %2679 = vmatpush.msra.mxu3 %v2678_v17  ;;  %v2696_v9 = vand.u32 4294901760, %v2695_v11  ;;  %v5365_v17 = vand.u32 4294901760, %v4781_v51  ;;  %v2702_v53 = vand.u32 4294901760, %v2701_v58  ;;  %v2713_v51 = vsub.f32 %v5003_v27, %v2712_v14 }
 0x178   :  { %2532 = vmatpush.msra.mxu0 %v5364_v26  ;;  %2610 = vmatpush.msra.mxu2 %v4924_v61  ;;  %v2708_v11 = vand.u32 4294901760, %v2707_v33 }
 0x179   :  { %2569 = vmatpush.msra.mxu1 %v4689_v10  ;;  %2685 = vmatpush.msra.mxu3 %v2684_v1  ;;  %v5366_v10 = vand.u32 4294901760, %v4793_v0  ;;  %v2724_v1 = vand.u32 4294901760, %v5030_v42  ;;  %v2626_v0 = vsub.f32 %v5019_v6, %v2625_v29  ;;  %v2714_v40 = vand.u32 4294901760, %v2713_v51 }
 0x17a   :  { %2536 = vmatpush.msra.mxu0 %v5365_v17  ;;  %2612 = vmatpush.msra.mxu2 %v4936_v59 }
 0x17b   :  { %2571 = vmatpush.msra.mxu1 %v4700_v13  ;;  %2691 = vmatpush.msra.mxu3 %v2690_v49  ;;  %v2719_v13 = vsub.f32 %v5016_v15, %v2718_v32  ;;  %v2725_v49 = vsub.f32 %v5030_v42, %v2724_v1 }
 0x17c   :  { %2540 = vmatpush.msra.mxu0 %v5366_v10  ;;  %2614 = vmatpush.msra.mxu2 %v4948_v22 }
 0x17d   :  { %2573 = vmatpush.msra.mxu1 %v4713_v45  ;;  %2697 = vmatpush.msra.mxu3 %v2696_v9  ;;  %v5368_v45 = vand.u32 4294901760, %v4832_v20  ;;  %v2720_v58 = vand.u32 4294901760, %v2719_v13  ;;  %v2726_v20 = vand.u32 4294901760, %v2725_v49 }
 0x17e   :  { %2544 = vmatpush.msra.mxu0 %v5367_v55  ;;  %2616 = vmatpush.msra.mxu2 %v4961_v56 }
 0x17f   :  { %2575 = vmatpush.msra.mxu1 %v4726_v12  ;;  %2703 = vmatpush.msra.mxu3 %v2702_v53  ;;  %v2627_v12 = vand.u32 4294901760, %v2626_v0 }
 0x180   :  { %2548 = vmatpush.msra.mxu0 %v5368_v45  ;;  %2618 = vmatpush.msra.mxu2 %v4977_v18 }
 0x181   :  { %2577 = vmatpush.msra.mxu1 %v4738_v34  ;;  %2709 = vmatpush.msra.mxu3 %v2708_v11  ;;  %v5369_v34 = vand.u32 4294901760, %v4825_v37 }
 0x182   :  { %2550 = vmatmul.f32.vlgmr.msra.gmra.mxu0 %v4746_v43  ;;  %2620 = vmatpush.msra.mxu2 %v4990_v19 }
 0x183   :  { %2735 = vmatpush.msrb.mxu0 %v4825_v37  ;;  %2579 = vmatpush.msra.mxu1 %v4752_v35  ;;  %v5370_v35 = vand.u32 4294901760, %v4846_v52  ;;  %v397_v37 = vpop.f32.mrf.mxu2 }
 0x184   :  { %2715 = vmatpush.msra.mxu3 %v2714_v40  ;;  %2622 = vmatpush.msra.mxu2 %v5005_v3 }
 0x185   :  { %2738 = vmatpush.msrb.mxu0 %v4846_v52  ;;  %2581 = vmatpush.msra.mxu1 %v4764_v39  ;;  %v5371_v39 = vand.u32 4294901760, %v4856_v25  ;;  %v5376_v52 = vand.u32 4294901760, %v4908_v47 }
 0x186   :  { %2721 = vmatpush.msra.mxu3 %v2720_v58  ;;  %2628 = vmatmul.f32.vlgmr.msra.gmra.mxu2 %v2627_v12 }
 0x187   :  { %2741 = vmatpush.msrb.mxu0 %v4856_v25  ;;  %2829 = vmatpush.msrb.mxu2 %v5369_v34  ;;  %v5378_v25 = vand.u32 4294901760, %v4934_v38 }
 0x188   :  { %2583 = vmatpush.msra.mxu1 %v4785_v57  ;;  %2727 = vmatpush.msra.mxu3 %v2726_v20  ;;  %v5372_v57 = vand.u32 4294901760, %v4864_v24 }
 0x189   :  { %2729 = vmatmul.f32.vlgmr.msra.gmra.mxu3 %v4992_v48  ;;  %2744 = vmatpush.msrb.mxu0 %v4864_v24  ;;  %v436_v24 = vpop.f32.mrf.mxu3 }
 0x18a   :  { %2833 = vmatpush.msrb.mxu2 %v5370_v35  ;;  %2896 = vmatpush.msrb.mxu3 %v4798_v63 }
 0x18b   :  { %2585 = vmatpush.msra.mxu1 %v4804_v2  ;;  %2747 = vmatpush.msrb.mxu0 %v4875_v62  ;;  %v5374_v2 = vld [vmem:[#allocation12_spill] sm:$0xff] }
 0x18c   :  { %2587 = vmatmul.f32.vlgmr.msra.gmra.mxu1 %v4746_v43  ;;  %2837 = vmatpush.msrb.mxu2 %v5371_v39  ;;  %v5373_v43 = vand.u32 4294901760, %v4875_v62 }
 0x18d   :  { %2788 = vmatpush.msrb.mxu1 %v4798_v63  ;;  %2898 = vmatpush.msrb.mxu3 %v4817_v30  ;;  %v5375_v63 = vand.u32 4294901760, %v4894_v23 }
 0x18e   :  { %2750 = vmatpush.msrb.mxu0 %v4894_v23  ;;  %2841 = vmatpush.msrb.mxu2 %v5372_v57 }
 0x18f   :  { %2790 = vmatpush.msrb.mxu1 %v4817_v30  ;;  %2900 = vmatpush.msrb.mxu3 %v4834_v21 }
 0x190   :  { %2753 = vmatpush.msrb.mxu0 %v4908_v47  ;;  %2845 = vmatpush.msrb.mxu2 %v5373_v43 }
 0x191   :  { %2792 = vmatpush.msrb.mxu1 %v4834_v21  ;;  %2902 = vmatpush.msrb.mxu3 %v5374_v2  ;;  %v5377_v21 = vand.u32 4294901760, %v4922_v7 }
 0x192   :  { %2756 = vmatpush.msrb.mxu0 %v4922_v7  ;;  %2849 = vmatpush.msrb.mxu2 %v5375_v63  ;;  %v343_v7 = vpop.f32.mrf.mxu1 }
 0x193   :  { %2794 = vmatpush.msrb.mxu1 %v5374_v2  ;;  %2904 = vmatpush.msrb.mxu3 %v4851_v41 }
 0x194   :  { %2759 = vmatpush.msrb.mxu0 %v4934_v38  ;;  %2853 = vmatpush.msrb.mxu2 %v5376_v52  ;;  %v684_v38 = vpop.f32.mrf.mxu3 }
 0x195   :  { %2796 = vmatpush.msrb.mxu1 %v4851_v41  ;;  %2906 = vmatpush.msrb.mxu3 %v4868_v36  ;;  %v242_v41 = vpop.f32.mrf.mxu0 }
 0x196   :  { %2762 = vmatpush.msrb.mxu0 %v4946_v60  ;;  %2857 = vmatpush.msrb.mxu2 %v5377_v21  ;;  %v344_v30 = vadd.f32 %v343_v7, %v242_v41 }
 0x197   :  { %2798 = vmatpush.msrb.mxu1 %v4868_v36  ;;  %2908 = vmatpush.msrb.mxu3 %v4883_v4 }
 0x198   :  { %2765 = vmatpush.msrb.mxu0 %v4959_v31  ;;  %2861 = vmatpush.msrb.mxu2 %v5378_v25  ;;  %v398_v62 = vadd.f32 %v397_v37, %v344_v30 }
 0x199   :  { %2800 = vmatpush.msrb.mxu1 %v4883_v4  ;;  %2910 = vmatpush.msrb.mxu3 %v4896_v28 }
 0x19a   :  { %2768 = vmatpush.msrb.mxu0 %v4972_v46  ;;  %2865 = vmatpush.msrb.mxu2 %v2688_v44  ;;  %v437_v36 = vadd.f32 %v436_v24, %v398_v62 }
 0x19b   :  { %2802 = vmatpush.msrb.mxu1 %v4896_v28  ;;  %2912 = vmatpush.msrb.mxu3 %v4910_v16  ;;  %v542_v28 = vpop.f32.mrf.mxu1 }
 0x19c   :  { %2771 = vmatpush.msrb.mxu0 %v4985_v54  ;;  %2869 = vmatpush.msrb.mxu2 %v2694_v50 }
 0x19d   :  { %2804 = vmatpush.msrb.mxu1 %v4910_v16  ;;  %2914 = vmatpush.msrb.mxu3 %v4924_v61  ;;  %v505_v4 = vpop.f32.mrf.mxu0  ;;  %v583_v16 = vpop.f32.mrf.mxu2 }
 0x19e   :  { %2774 = vmatpush.msrb.mxu0 %v5003_v27  ;;  %2873 = vmatpush.msrb.mxu2 %v2700_v5  ;;  %v506_v23 = vadd.f32 %v505_v4, %v437_v36 }
 0x19f   :  { %2806 = vmatpush.msrb.mxu1 %v4924_v61  ;;  %2916 = vmatpush.msrb.mxu3 %v4936_v59 }
 0x1a0   :  { %2777 = vmatpush.msrb.mxu0 %v5016_v15  ;;  %2877 = vmatpush.msrb.mxu2 %v2706_v8  ;;  %v543_v47 = vadd.f32 %v542_v28, %v506_v23  ;;  %v2932_v23 = vld [vmem:[#allocation5] sm:$0x1] }
 0x1a1   :  { %2808 = vmatpush.msrb.mxu1 %v4936_v59  ;;  %2918 = vmatpush.msrb.mxu3 %v4948_v22  ;;  %2973 = vrcp.f32 %v2932_v23  ;;  %vm2938_vm0 = vweird.f32 %v2932_v23 }
 0x1a2   :  { %2780 = vmatpush.msrb.mxu0 %v5030_v42  ;;  %2881 = vmatpush.msrb.mxu2 %v2712_v14  ;;  %v584_v61 = vadd.f32 %v583_v16, %v543_v47 }
 0x1a3   :  { %2810 = vmatpush.msrb.mxu1 %v4948_v22  ;;  %2920 = vmatpush.msrb.mxu3 %v4961_v56  ;;  %v777_v22 = vpop.f32.mrf.mxu1 }
 0x1a4   :  { %2783 = vmatmul.f32.vlgmr.msrb.gmra.mxu0 %v5019_v6  ;;  %2885 = vmatpush.msrb.mxu2 %v2718_v32  ;;  %v685_v60 = vadd.f32 %v684_v38, %v584_v61 }
 0x1a5   :  { %2812 = vmatpush.msrb.mxu1 %v4961_v56  ;;  %2922 = vmatpush.msrb.mxu3 %v4977_v18  ;;  %v738_v59 = vpop.f32.mrf.mxu0  ;;  %v846_v56 = vpop.f32.mrf.mxu2 }
 0x1a6   :  { %2889 = vmatpush.msrb.mxu2 %v2724_v1  ;;  %v739_v46 = vadd.f32 %v738_v59, %v685_v60 }
 0x1a7   :  { %2814 = vmatpush.msrb.mxu1 %v4977_v18  ;;  %2924 = vmatpush.msrb.mxu3 %v4990_v19  ;;  %v883_v18 = vpop.f32.mrf.mxu3  ;;  %v2974_v59 = vpop.eup %2973 }
 0x1a8   :  { %2891 = vmatmul.f32.vlgmr.msrb.gmra.mxu2 %v4992_v48  ;;  %v778_v31 = vadd.f32 %v777_v22, %v739_v46  ;;  %vm2939_vm1 = vweird.f32 %v2974_v59 }
 0x1a9   :  { %2816 = vmatpush.msrb.mxu1 %v4990_v19  ;;  %2926 = vmatpush.msrb.mxu3 %v5005_v3  ;;  %vm2940_vm2 = vmor %vm2938_vm0, %vm2939_vm1 }
 0x1aa   :  { %2928 = vmatmul.f32.vlgmr.msrb.gmra.mxu3 %v4992_v48  ;;  %v847_v44 = vadd.f32 %v846_v56, %v778_v31  ;;  %v2934_v31 = vmul.f32 %v2974_v59, %v2932_v23 }
 0x1ab   :  { %2818 = vmatpush.msrb.mxu1 %v5005_v3  ;;  %v1025_v19 = vpop.f32.mrf.mxu1 }
 0x1ac   :  { %2822 = vmatmul.f32.vlgmr.msrb.gmra.mxu1 %v2625_v29  ;;  %v884_v54 = vadd.f32 %v883_v18, %v847_v44 }
 0x1ad   :  { %v924_v50 = vpop.f32.mrf.mxu0  ;;  %v1079_v27 = vpop.f32.mrf.mxu2 }
 0x1ae   :  { %v925_v48 = vadd.f32 %v924_v50, %v884_v54  ;;  %v2935_v50 = vsub.f32 1.0, %v2934_v31 }
 0x1af   :  { %v1118_v8 = vpop.f32.mrf.mxu3 }
 0x1b0   :  { %v1026_v5 = vadd.f32 %v1025_v19, %v925_v48  ;;  %v2936_v48 = vmul.f32 %v2974_v59, %v2935_v50 }
 0x1b2   :  { %v1080_v3 = vadd.f32 %v1079_v27, %v1026_v5 }
 0x1b3   :  { %v1224_v26 = vpop.f32.mrf.mxu1 }
 0x1b4   :  { %v1119_v6 = vadd.f32 %v1118_v8, %v1080_v3  ;;  %v2944_v3 = vand.u32 2147483648, %v2932_v23 }
 0x1b5   :  { %v1187_v15 = vpop.f32.mrf.mxu0  ;;  %v1265_v9 = vpop.f32.mrf.mxu2 }
 0x1b6   :  { %v1188_v14 = vadd.f32 %v1187_v15, %v1119_v6  ;;  %v2937_v15 = vadd.f32 %v2974_v59, %v2936_v48  ;;  %v2942_v6 = vand.u32 2147483647, %v2932_v23 }
 0x1b7   :  { %v1366_v17 = vpop.f32.mrf.mxu3 }
 0x1b8   :  { %v1225_v42 = vadd.f32 %v1224_v26, %v1188_v14  ;;  %vm2943_vm3 = vcmp.eq.f32.partialorder %v2942_v6, 8.507059e+37 }
 0x1ba   :  { %v1266_v33 = vadd.f32 %v1265_v9, %v1225_v42  ;;  %v2945_v42 = vor.u32 1.1754944e-38, %v2944_v3 }
 0x1bb   :  { %v1459_v53 = vpop.f32.mrf.mxu1 }
 0x1bc   :  { %v1367_v29 = vadd.f32 %v1366_v17, %v1266_v33  ;;  %v2941_v33 = vsel %vm2940_vm2, %v2974_v59, %v2937_v15 }
 0x1bd   :  { %v1420_v32 = vpop.f32.mrf.mxu0  ;;  %v1528_v1 = vpop.f32.mrf.mxu2 }
 0x1be   :  { %v1421_v10 = vadd.f32 %v1420_v32, %v1367_v29 }
 0x1bf   :  { %v1565_v55 = vpop.f32.mrf.mxu3 }
 0x1c0   :  { %v1460_v51 = vadd.f32 %v1459_v53, %v1421_v10  ;;  %v2946_v53 = vsel %vm2943_vm3, %v2945_v42, %v2941_v33 }
 0x1c2   :  { %v1529_v11 = vadd.f32 %v1528_v1, %v1460_v51 }
 0x1c3   :  { %v1707_v45 = vpop.f32.mrf.mxu1 }
 0x1c4   :  { %v1566_v0 = vadd.f32 %v1565_v55, %v1529_v11 }
 0x1c5   :  { %v1606_v13 = vpop.f32.mrf.mxu0  ;;  %v1761_v58 = vpop.f32.mrf.mxu2 }
 0x1c6   :  { %v1607_v40 = vadd.f32 %v1606_v13, %v1566_v0 }
 0x1c7   :  { %v1800_v20 = vpop.f32.mrf.mxu3 }
 0x1c8   :  { %v1708_v49 = vadd.f32 %v1707_v45, %v1607_v40 }
 0x1ca   :  { %v1762_v12 = vadd.f32 %v1761_v58, %v1708_v49 }
 0x1cb   :  { %v1906_v39 = vpop.f32.mrf.mxu1 }
 0x1cc   :  { %v1801_v35 = vadd.f32 %v1800_v20, %v1762_v12 }
 0x1cd   :  { %v1869_v34 = vpop.f32.mrf.mxu0  ;;  %v1947_v2 = vpop.f32.mrf.mxu2 }
 0x1ce   :  { %v1870_v57 = vadd.f32 %v1869_v34, %v1801_v35 }
 0x1cf   :  { %v2048_v52 = vpop.f32.mrf.mxu3 }
 0x1d0   :  { %v1907_v43 = vadd.f32 %v1906_v39, %v1870_v57 }
 0x1d2   :  { %v1948_v63 = vadd.f32 %v1947_v2, %v1907_v43 }
 0x1d3   :  { %v2141_v7 = vpop.f32.mrf.mxu1 }
 0x1d4   :  { %v2049_v25 = vadd.f32 %v2048_v52, %v1948_v63 }
 0x1d5   :  { %v2102_v21 = vpop.f32.mrf.mxu0  ;;  %v2210_v37 = vpop.f32.mrf.mxu2 }
 0x1d6   :  { %v2103_v41 = vadd.f32 %v2102_v21, %v2049_v25 }
 0x1d7   :  { %v2247_v24 = vpop.f32.mrf.mxu3 }
 0x1d8   :  { %v2142_v30 = vadd.f32 %v2141_v7, %v2103_v41 }
 0x1da   :  { %v2211_v62 = vadd.f32 %v2210_v37, %v2142_v30 }
 0x1dc   :  { %v2248_v4 = vadd.f32 %v2247_v24, %v2211_v62 }
 0x1dd   :  { %v2288_v36 = vpop.f32.mrf.mxu0 }
 0x1de   :  { %v2289_v47 = vadd.f32 %v2288_v36, %v2248_v4 }
 0x1e7   :  { %v2389_v28 = vpop.f32.mrf.mxu1  ;;  %v2443_v61 = vpop.f32.mrf.mxu2 }
 0x1e8   :  { %v2390_v16 = vadd.f32 %v2389_v28, %v2289_v47 }
 0x1ea   :  { %v2444_v38 = vadd.f32 %v2443_v61, %v2390_v16  ;;  %v2482_v60 = vpop.f32.mrf.mxu3 }
 0x1ec   :  { %v2483_v46 = vadd.f32 %v2482_v60, %v2444_v38 }
 0x1ff   :  { %v2551_v22 = vpop.f32.mrf.mxu0 }
 0x200   :  { %v2552_v44 = vadd.f32 %v2551_v22, %v2483_v46 }
 0x209   :  { %v2588_v56 = vpop.f32.mrf.mxu1  ;;  %v2629_v54 = vpop.f32.mrf.mxu2 }
 0x20a   :  { %v2589_v18 = vadd.f32 %v2588_v56, %v2552_v44 }
 0x20c   :  { %v2630_v19 = vadd.f32 %v2629_v54, %v2589_v18  ;;  %v2730_v5 = vpop.f32.mrf.mxu3 }
 0x20e   :  { %v2731_v8 = vadd.f32 %v2730_v5, %v2630_v19 }
 0x221   :  { %v2784_v27 = vpop.f32.mrf.mxu0 }
 0x222   :  { %v2785_v26 = vadd.f32 %v2784_v27, %v2731_v8 }
 0x229   :  { %v2823_v14 = vpop.f32.mrf.mxu1 }
 0x22a   :  { %v2824_v9 = vadd.f32 %v2823_v14, %v2785_v26 }
 0x22b   :  { %v2892_v17 = vpop.f32.mrf.mxu2 }
 0x22c   :  { %v2893_v32 = vadd.f32 %v2892_v17, %v2824_v9 }
 0x22d   :  { %v2929_v29 = vpop.f32.mrf.mxu3 }
 0x22e   :  { %v2930_v10 = vadd.f32 %v2929_v29, %v2893_v32 }
 0x230   :  { %v2947_v51 = vmul.f32 %v2946_v53, %v2930_v10 }
 0x232   :  { %2948 = vst [vmem:[#allocation8] sm:$0x1] %v2947_v51 }
 0x233   :  { %2959 = dma.vmem_to_hbm [thread:$0]  %s2955_s2, 16, %s2957_s30, [#allocation4]  }
 0x234   :  { %3077 = dma.done.wait [#allocation4], 16  }
 0x235   :  { %3078 = vsyncadd [#allocation4], 4294967280 }
 0x236   :  { %2964 = vsyncpa [#allocation3], 1 }
 0x237   :  { %2965 = vsyncpa [#allocation6], 1 }
 0x238   :  { %2966 = vsyncpa [#allocation4], 1 }

</bundles_post_ra>
